<compile_context>
chip_gen: v7x
topology: tpu7x:2x2x1
jax: 0.10.0
libtpu: 0.0.40
codegen_flags: <defaults>
</compile_context>

<pallas_src>
import jax
import jax.numpy as jnp
from jax.experimental import pallas as pl
from jax.experimental.pallas import tpu as pltpu

_H1 = 400          # logical hidden sizes (PyTorch)
_H2 = 300
_H1P = 512         # padded lane-aligned hidden sizes (4*128, 3*128)
_H2P = 384


def _round_up(n, m):
    return ((n + m - 1) // m) * m


# --------------------------------------------------------------------------- #
# Kernel
# --------------------------------------------------------------------------- #
def _critic_kernel(xu_ref,
                   w1_ref, b1_ref,
                   w2_ref, b2_ref,
                   w5_ref, b5_ref,
                   wh_ref, bh_ref,
                   q_ref):
    """One batch tile of the twin-Q critic (all matmuls bf16 -> f32 acc)."""
    xu = xu_ref[...].astype(jnp.bfloat16)

    # Layer 1, both branches fused along N: [tb, K] x [K, 2*H1P].
    h = jnp.dot(xu, w1_ref[...], preferred_element_type=jnp.float32)
    h = jnp.maximum(h + b1_ref[...], 0.0).astype(jnp.bfloat16)
    h1 = h[:, :_H1P]                     # lane-aligned (512 = 4*128) slices
    h2 = h[:, _H1P:]

    # Layer 2, per branch: [tb, 512] x [512, 384].
    g1 = jnp.dot(h1, w2_ref[...], preferred_element_type=jnp.float32)
    g1 = jnp.maximum(g1 + b2_ref[...], 0.0).astype(jnp.bfloat16)
    g2 = jnp.dot(h2, w5_ref[...], preferred_element_type=jnp.float32)
    g2 = jnp.maximum(g2 + b5_ref[...], 0.0).astype(jnp.bfloat16)

    # Fused head: one [tb, 768] x [768, 2] dot + [1, 2] bias row.
    g = jnp.concatenate([g1, g2], axis=1)
    q = jnp.dot(g, wh_ref[...], preferred_element_type=jnp.float32)
    q_ref[...] = q + bh_ref[...]


# --------------------------------------------------------------------------- #
# Parameter repacking (one-time, outside the hot path)
# --------------------------------------------------------------------------- #
def prepare_critic_params(params):
    """Repack PyTorch-style params into kernel-ready, padded, bf16 arrays.

    params[name] = (w [in, out] f32, b [1, out] f32), names l1..l6.
    """
    (w1, b1), (w2, b2), (w3, b3) = params["l1"], params["l2"], params["l3"]
    (w4, b4), (w5, b5), (w6, b6) = params["l4"], params["l5"], params["l6"]
    bf, f32 = jnp.bfloat16, jnp.float32

    def pad_to(a, rows, cols):
        return jnp.pad(a, ((0, rows - a.shape[0]), (0, cols - a.shape[1])))

    k = w1.shape[0]
    # Layer 1: both branches fused along N, each zero-padded to 512 lanes.
    w1f = jnp.concatenate([pad_to(w1, k, _H1P), pad_to(w4, k, _H1P)], axis=1)
    b1f = jnp.concatenate([pad_to(b1, 1, _H1P), pad_to(b4, 1, _H1P)], axis=1)
    # Fused head: w3 -> column 0 (rows 0:300), w6 -> column 1 (rows 384:684).
    wh = jnp.zeros((2 * _H2P, 2), f32)
    wh = wh.at[:_H2, 0].set(w3[:, 0]).at[_H2P:_H2P + _H2, 1].set(w6[:, 0])
    bh = jnp.concatenate([b3.reshape(-1), b6.reshape(-1)]).reshape(1, 2)

    return dict(
        w1f=w1f.astype(bf), b1f=b1f.astype(f32),
        w2p=pad_to(w2, _H1P, _H2P).astype(bf), b2p=pad_to(b2, 1, _H2P).astype(f32),
        w5p=pad_to(w5, _H1P, _H2P).astype(bf), b5p=pad_to(b5, 1, _H2P).astype(f32),
        wh=wh.astype(bf), bh=bh.astype(f32),
    )


# --------------------------------------------------------------------------- #
# Wrapper
# --------------------------------------------------------------------------- #
def _pick_tile(batch, tile_b):
    """Batch-tile rows: 256-aligned for large batches (MXU M-pass granularity),
    and >= 2 grid steps once batch >= 512 so v7x's two TensorCores both work."""
    if batch <= 256:
        return _round_up(batch, 8)
    tb = _round_up(min(tile_b, batch), 256)
    if batch >= 512:
        tb = min(tb, _round_up(pl.cdiv(batch, 2), 256))
    return tb


def critic_forward(x, u, prep, *, tile_b=1024):
    """Returns (q1, q2), each [batch, 1] f32."""
    batch = x.shape[0]
    xu = jnp.concatenate([x, u], axis=1).astype(jnp.float32)
    in_dim = xu.shape[1]

    tb = _pick_tile(batch, int(tile_b))
    bp = _round_up(batch, tb)
    if bp != batch:
        xu = jnp.pad(xu, ((0, bp - batch), (0, 0)))

    grid = (bp // tb,)
    row_map = lambda i: (i, 0)          # batch-tiled operands
    const_map = lambda i: (0, 0)        # weights/biases: fetched once, resident

    in_specs = [
        pl.BlockSpec((tb, in_dim), row_map),          # xu
        pl.BlockSpec((in_dim, 2 * _H1P), const_map),  # fused layer-1 weight
        pl.BlockSpec((1, 2 * _H1P), const_map),       # fused layer-1 bias
        pl.BlockSpec((_H1P, _H2P), const_map),        # layer-2 (Q1)
        pl.BlockSpec((1, _H2P), const_map),
        pl.BlockSpec((_H1P, _H2P), const_map),        # layer-5 (Q2)
        pl.BlockSpec((1, _H2P), const_map),
        pl.BlockSpec((2 * _H2P, 2), const_map),       # fused head weight
        pl.BlockSpec((1, 2), const_map),              # fused head bias
    ]

    flops = 2 * bp * (in_dim * 2 * _H1P + 2 * _H1P * _H2P + 2 * _H2P * 2)
    weight_bytes = (2 * (in_dim * 2 * _H1P + 2 * _H1P * _H2P + 2 * _H2P * 2)
                    + 4 * (2 * _H1P + 2 * _H2P + 2))
    bytes_accessed = weight_bytes + 4 * bp * (in_dim + 2)

    # Per-step VMEM estimate: f32+bf16 layer-1/2 activations + concatenated head
    # input + double-buffered xu / q tiles + double-buffered resident weights.
    act_bytes = tb * (2 * _H1P * 6 + 2 * _H2P * 6 + 2 * _H2P * 2)
    io_bytes = 2 * tb * (in_dim + 2) * 4
    vmem_limit = int(min(56 << 20,
                         max(32 << 20, 2 * (act_bytes + io_bytes) + 2 * weight_bytes)))

    q = pl.pallas_call(
        _critic_kernel,
        out_shape=jax.ShapeDtypeStruct((bp, 2), jnp.float32),
        grid=grid,
        in_specs=in_specs,
        out_specs=pl.BlockSpec((tb, 2), row_map),
        compiler_params=pltpu.CompilerParams(
            dimension_semantics=("parallel",),
            vmem_limit_bytes=vmem_limit),
        cost_estimate=pl.CostEstimate(
            flops=flops, transcendentals=0, bytes_accessed=bytes_accessed),
    )(xu, prep["w1f"], prep["b1f"], prep["w2p"], prep["b2p"],
      prep["w5p"], prep["b5p"], prep["wh"], prep["bh"])

    q = q[:batch]
    return q[:, 0:1], q[:, 1:2]


# --------------------------------------------------------------------------- #
# Init + references
# --------------------------------------------------------------------------- #
def init_critic_params(state_dim, action_dim, key):
    """PyTorch nn.Linear-style init: U[-1/sqrt(fan_in), +1/sqrt(fan_in)]."""
    dims = [(state_dim + action_dim, _H1), (_H1, _H2), (_H2, 1),
            (state_dim + action_dim, _H1), (_H1, _H2), (_H2, 1)]
    names = ("l1", "l2", "l3", "l4", "l5", "l6")
    params = {}
    for name, (fan_in, fan_out) in zip(names, dims):
        key, kw, kb = jax.random.split(key, 3)
        bound = 1.0 / jnp.sqrt(jnp.float32(fan_in))
        w = jax.random.uniform(kw, (fan_in, fan_out), jnp.float32, -bound, bound)
        b = jax.random.uniform(kb, (1, fan_out), jnp.float32, -bound, bound)
        params[name] = (w, b)
    return params


def critic_forward_ref_bf16(x, u, prep):
    """Pure-JAX reference matching the kernel's bf16-stream / f32-acc math."""
    xu = jnp.concatenate([x, u], axis=1).astype(jnp.bfloat16)
    h = jnp.dot(xu, prep["w1f"], preferred_element_type=jnp.float32)
    h = jnp.maximum(h + prep["b1f"], 0.0).astype(jnp.bfloat16)
    h1, h2 = h[:, :_H1P], h[:, _H1P:]
    g1 = jnp.maximum(jnp.dot(h1, prep["w2p"], preferred_element_type=jnp.float32)
                     + prep["b2p"], 0.0).astype(jnp.bfloat16)
    g2 = jnp.maximum(jnp.dot(h2, prep["w5p"], preferred_element_type=jnp.float32)
                     + prep["b5p"], 0.0).astype(jnp.bfloat16)
    g = jnp.concatenate([g1, g2], axis=1)
    q = jnp.dot(g, prep["wh"], preferred_element_type=jnp.float32) + prep["bh"]
    return q[:, 0:1], q[:, 1:2]


def critic_forward_ref_f32(x, u, params):
    """Full-precision reference (original PyTorch semantics)."""
    xu = jnp.concatenate([x, u], axis=1)

    def mlp(a, b, c):
        w, bias = params[a]
        h = jnp.maximum(xu @ w + bias, 0.0)
        w, bias = params[b]
        h = jnp.maximum(h @ w + bias, 0.0)
        w, bias = params[c]
        return h @ w + bias

    return mlp("l1", "l2", "l3"), mlp("l4", "l5", "l6")


if __name__ == "__main__":
    state_dim = 16
    action_dim = 8
    batch = 8

    key = jax.random.PRNGKey(0)
    kx, ku, kp = jax.random.split(key, 3)
    x = jax.random.normal(kx, (batch, state_dim), jnp.float32)
    u = jax.random.normal(ku, (batch, action_dim), jnp.float32)
    params = init_critic_params(state_dim, action_dim, kp)
    prep = prepare_critic_params(params)

    q1, q2 = critic_forward(x, u, prep)
    jax.block_until_ready((q1, q2))

    assert q1.shape == (batch, 1) and q2.shape == (batch, 1)

    # Exact-math reference (bf16 weights, f32 accumulate) — tight tolerance.
    r1, r2 = critic_forward_ref_bf16(x, u, prep)
    assert jnp.allclose(q1, r1, atol=5e-3, rtol=5e-3), "Q1 mismatch (bf16 ref)"
    assert jnp.allclose(q2, r2, atol=5e-3, rtol=5e-3), "Q2 mismatch (bf16 ref)"

    # Original f32 semantics — loose tolerance covering bf16 weight streaming.
    f1, f2 = critic_forward_ref_f32(x, u, params)
    assert jnp.allclose(q1, f1, atol=5e-2, rtol=5e-2), "Q1 mismatch (f32 ref)"
    assert jnp.allclose(q2, f2, atol=5e-2, rtol=5e-2), "Q2 mismatch (f32 ref)"

    print("KERNEL_OK")
</pallas_src>

<mosaic_0001>
module attributes {stable_mosaic.version = 11 : i64} {
  func.func @_critic_kernel(%arg0: i32, %arg1: memref<8x24xf32, #tpu.memory_space<vmem>>, %arg2: memref<24x1024xbf16, #tpu.memory_space<vmem>>, %arg3: memref<1x1024xf32, #tpu.memory_space<vmem>>, %arg4: memref<512x384xbf16, #tpu.memory_space<vmem>>, %arg5: memref<1x384xf32, #tpu.memory_space<vmem>>, %arg6: memref<512x384xbf16, #tpu.memory_space<vmem>>, %arg7: memref<1x384xf32, #tpu.memory_space<vmem>>, %arg8: memref<768x2xbf16, #tpu.memory_space<vmem>>, %arg9: memref<1x2xf32, #tpu.memory_space<vmem>>, %arg10: memref<8x2xf32, #tpu.memory_space<vmem>>) attributes {dimension_semantics = [#tpu.dimension_semantics<parallel>], iteration_bounds = array<i64: 1>, scalar_prefetch = 0 : i64, scratch_operands = 0 : i64, tpu.core_type = #tpu.core_type<tc>, window_params = [{transform_indices = @transform_0, window_bounds = array<i64: 8, 24>}, {pipeline_mode = #tpu.pipeline_mode<synchronous>, transform_indices = @transform_1, window_bounds = array<i64: 24, 1024>}, {pipeline_mode = #tpu.pipeline_mode<synchronous>, transform_indices = @transform_2, window_bounds = array<i64: 1, 1024>}, {pipeline_mode = #tpu.pipeline_mode<synchronous>, transform_indices = @transform_3, window_bounds = array<i64: 512, 384>}, {pipeline_mode = #tpu.pipeline_mode<synchronous>, transform_indices = @transform_4, window_bounds = array<i64: 1, 384>}, {pipeline_mode = #tpu.pipeline_mode<synchronous>, transform_indices = @transform_5, window_bounds = array<i64: 512, 384>}, {pipeline_mode = #tpu.pipeline_mode<synchronous>, transform_indices = @transform_6, window_bounds = array<i64: 1, 384>}, {pipeline_mode = #tpu.pipeline_mode<synchronous>, transform_indices = @transform_7, window_bounds = array<i64: 768, 2>}, {pipeline_mode = #tpu.pipeline_mode<synchronous>, transform_indices = @transform_8, window_bounds = array<i64: 1, 2>}, {transform_indices = @transform_9, window_bounds = array<i64: 8, 2>}]} {
    %c0 = arith.constant 0 : index
    %c0_0 = arith.constant 0 : index
    %0 = vector.load %arg1[%c0, %c0_0] : memref<8x24xf32, #tpu.memory_space<vmem>>, vector<8x24xf32>
    %1 = arith.truncf %0 : vector<8x24xf32> to vector<8x24xbf16>
    %c0_1 = arith.constant 0 : index
    %c0_2 = arith.constant 0 : index
    %2 = vector.load %arg2[%c0_1, %c0_2] : memref<24x1024xbf16, #tpu.memory_space<vmem>>, vector<24x1024xbf16>
    %cst = arith.constant dense<0.000000e+00> : vector<8x1024xf32>
    %3 = tpu.matmul %1, %2, %cst {dimension_numbers = #tpu.dot_dimension_numbers<[1], [0], [0], [1], [0, 0, 1, 1], [], []>} : vector<8x24xbf16>, vector<24x1024xbf16>, vector<8x1024xf32> -> vector<8x1024xf32>
    %c0_3 = arith.constant 0 : index
    %c0_4 = arith.constant 0 : index
    %4 = vector.load %arg3[%c0_3, %c0_4] : memref<1x1024xf32, #tpu.memory_space<vmem>>, vector<1x1024xf32>
    %5 = vector.broadcast %4 : vector<1x1024xf32> to vector<8x1024xf32>
    %6 = arith.addf %3, %5 : vector<8x1024xf32>
    %cst_5 = arith.constant 0.000000e+00 : f32
    %7 = vector.broadcast %cst_5 : f32 to vector<8x1024xf32>
    %8 = arith.maximumf %6, %7 : vector<8x1024xf32>
    %9 = arith.truncf %8 : vector<8x1024xf32> to vector<8x1024xbf16>
    %10 = vector.extract_strided_slice %9 {offsets = [0, 0], sizes = [8, 512], strides = [1, 1]} : vector<8x1024xbf16> to vector<8x512xbf16>
    %11 = vector.extract_strided_slice %9 {offsets = [0, 512], sizes = [8, 512], strides = [1, 1]} : vector<8x1024xbf16> to vector<8x512xbf16>
    %c0_6 = arith.constant 0 : index
    %c0_7 = arith.constant 0 : index
    %12 = vector.load %arg4[%c0_6, %c0_7] : memref<512x384xbf16, #tpu.memory_space<vmem>>, vector<512x384xbf16>
    %cst_8 = arith.constant dense<0.000000e+00> : vector<8x384xf32>
    %13 = tpu.matmul %10, %12, %cst_8 {dimension_numbers = #tpu.dot_dimension_numbers<[1], [0], [0], [1], [0, 0, 1, 1], [], []>} : vector<8x512xbf16>, vector<512x384xbf16>, vector<8x384xf32> -> vector<8x384xf32>
    %c0_9 = arith.constant 0 : index
    %c0_10 = arith.constant 0 : index
    %14 = vector.load %arg5[%c0_9, %c0_10] : memref<1x384xf32, #tpu.memory_space<vmem>>, vector<1x384xf32>
    %15 = vector.broadcast %14 : vector<1x384xf32> to vector<8x384xf32>
    %16 = arith.addf %13, %15 : vector<8x384xf32>
    %cst_11 = arith.constant 0.000000e+00 : f32
    %17 = vector.broadcast %cst_11 : f32 to vector<8x384xf32>
    %18 = arith.maximumf %16, %17 : vector<8x384xf32>
    %19 = arith.truncf %18 : vector<8x384xf32> to vector<8x384xbf16>
    %c0_12 = arith.constant 0 : index
    %c0_13 = arith.constant 0 : index
    %20 = vector.load %arg6[%c0_12, %c0_13] : memref<512x384xbf16, #tpu.memory_space<vmem>>, vector<512x384xbf16>
    %cst_14 = arith.constant dense<0.000000e+00> : vector<8x384xf32>
    %21 = tpu.matmul %11, %20, %cst_14 {dimension_numbers = #tpu.dot_dimension_numbers<[1], [0], [0], [1], [0, 0, 1, 1], [], []>} : vector<8x512xbf16>, vector<512x384xbf16>, vector<8x384xf32> -> vector<8x384xf32>
    %c0_15 = arith.constant 0 : index
    %c0_16 = arith.constant 0 : index
    %22 = vector.load %arg7[%c0_15, %c0_16] : memref<1x384xf32, #tpu.memory_space<vmem>>, vector<1x384xf32>
    %23 = vector.broadcast %22 : vector<1x384xf32> to vector<8x384xf32>
    %24 = arith.addf %21, %23 : vector<8x384xf32>
    %cst_17 = arith.constant 0.000000e+00 : f32
    %25 = vector.broadcast %cst_17 : f32 to vector<8x384xf32>
    %26 = arith.maximumf %24, %25 : vector<8x384xf32>
    %27 = arith.truncf %26 : vector<8x384xf32> to vector<8x384xbf16>
    %28 = tpu.concatenate %19, %27 in 1 : vector<8x384xbf16>, vector<8x384xbf16> -> vector<8x768xbf16>
    %c0_18 = arith.constant 0 : index
    %c0_19 = arith.constant 0 : index
    %29 = vector.load %arg8[%c0_18, %c0_19] : memref<768x2xbf16, #tpu.memory_space<vmem>>, vector<768x2xbf16>
    %cst_20 = arith.constant dense<0.000000e+00> : vector<8x2xf32>
    %30 = tpu.matmul %28, %29, %cst_20 {dimension_numbers = #tpu.dot_dimension_numbers<[1], [0], [0], [1], [0, 0, 1, 1], [], []>} : vector<8x768xbf16>, vector<768x2xbf16>, vector<8x2xf32> -> vector<8x2xf32>
    %c0_21 = arith.constant 0 : index
    %c0_22 = arith.constant 0 : index
    %31 = vector.load %arg9[%c0_21, %c0_22] : memref<1x2xf32, #tpu.memory_space<vmem>>, vector<1x2xf32>
    %32 = vector.broadcast %31 : vector<1x2xf32> to vector<8x2xf32>
    %33 = arith.addf %30, %32 : vector<8x2xf32>
    %c0_23 = arith.constant 0 : index
    %c0_24 = arith.constant 0 : index
    %34 = vector.load %arg10[%c0_23, %c0_24] : memref<8x2xf32, #tpu.memory_space<vmem>>, vector<8x2xf32>
    tpu.vector_store %arg10[%c0_23, %c0_24], %33 {strides = array<i32>} : memref<8x2xf32, #tpu.memory_space<vmem>>, vector<8x2xf32>,
    return
  }
  func.func @transform_0(%arg0: i32) -> (i32, i32) {
    %c0_i32 = arith.constant 0 : i32
    %c0_i32_0 = arith.constant 0 : i32
    return %arg0, %c0_i32 : i32, i32
  }
  func.func @transform_1(%arg0: i32) -> (i32, i32) {
    %c0_i32 = arith.constant 0 : i32
    %c0_i32_0 = arith.constant 0 : i32
    %c0_i32_1 = arith.constant 0 : i32
    return %c0_i32, %c0_i32_0 : i32, i32
  }
  func.func @transform_2(%arg0: i32) -> (i32, i32) {
    %c0_i32 = arith.constant 0 : i32
    %c0_i32_0 = arith.constant 0 : i32
    %c0_i32_1 = arith.constant 0 : i32
    return %c0_i32, %c0_i32_0 : i32, i32
  }
  func.func @transform_3(%arg0: i32) -> (i32, i32) {
    %c0_i32 = arith.constant 0 : i32
    %c0_i32_0 = arith.constant 0 : i32
    %c0_i32_1 = arith.constant 0 : i32
    return %c0_i32, %c0_i32_0 : i32, i32
  }
  func.func @transform_4(%arg0: i32) -> (i32, i32) {
    %c0_i32 = arith.constant 0 : i32
    %c0_i32_0 = arith.constant 0 : i32
    %c0_i32_1 = arith.constant 0 : i32
    return %c0_i32, %c0_i32_0 : i32, i32
  }
  func.func @transform_5(%arg0: i32) -> (i32, i32) {
    %c0_i32 = arith.constant 0 : i32
    %c0_i32_0 = arith.constant 0 : i32
    %c0_i32_1 = arith.constant 0 : i32
    return %c0_i32, %c0_i32_0 : i32, i32
  }
  func.func @transform_6(%arg0: i32) -> (i32, i32) {
    %c0_i32 = arith.constant 0 : i32
    %c0_i32_0 = arith.constant 0 : i32
    %c0_i32_1 = arith.constant 0 : i32
    return %c0_i32, %c0_i32_0 : i32, i32
  }
  func.func @transform_7(%arg0: i32) -> (i32, i32) {
    %c0_i32 = arith.constant 0 : i32
    %c0_i32_0 = arith.constant 0 : i32
    %c0_i32_1 = arith.constant 0 : i32
    return %c0_i32, %c0_i32_0 : i32, i32
  }
  func.func @transform_8(%arg0: i32) -> (i32, i32) {
    %c0_i32 = arith.constant 0 : i32
    %c0_i32_0 = arith.constant 0 : i32
    %c0_i32_1 = arith.constant 0 : i32
    return %c0_i32, %c0_i32_0 : i32, i32
  }
  func.func @transform_9(%arg0: i32) -> (i32, i32) {
    %c0_i32 = arith.constant 0 : i32
    %c0_i32_0 = arith.constant 0 : i32
    return %arg0, %c0_i32 : i32, i32
  }
}

</mosaic_0001>

<bundles_post_ra>
// kernel: tpu_custom_call.1
= control target key start
LH: loop header
LB: loop body
LE: loop exit
PB: predicated region body
PF: predicated region fallthrough
CT: control target
= control target key end

     0   :  { %14 = vsyncpa [#allocation3], 0  ;;  %s3712_s0 = inlined_call_operand.vmem [shape: f32[8,24], index: 0, kind: input, shape index: {}]   ;;  %s3713_s1 = inlined_call_operand.vmem [shape: bf16[24,1024], index: 1, kind: input, shape index: {}]   ;;  %s3714_s2 = inlined_call_operand.vmem [shape: f32[1,1024], index: 2, kind: input, shape index: {}]   ;;  %s3715_s3 = inlined_call_operand.hbm [shape: bf16[512,384], index: 3, kind: input, shape index: {}]   ;;  %s3716_s4 = inlined_call_operand.vmem [shape: f32[1,384], index: 4, kind: input, shape index: {}]   ;;  %s3717_s5 = inlined_call_operand.hbm [shape: bf16[512,384], index: 5, kind: input, shape index: {}]   ;;  %s3718_s6 = inlined_call_operand.vmem [shape: f32[1,384], index: 6, kind: input, shape index: {}]   ;;  %s3719_s7 = inlined_call_operand.vmem [shape: bf16[768,2], index: 7, kind: input, shape index: {}]   ;;  %s3720_s8 = inlined_call_operand.vmem [shape: f32[1,2], index: 8, kind: input, shape index: {}]   ;;  %s3721_s9 = inlined_call_operand.vmem [shape: f32[8,2], index: 9, kind: output, shape index: {}]  }
   0x1   :  { %15 = vsyncpa [#allocation5], 0  ;;  %s3351_s30 = smov [#allocation2]   ;;  %s3303_s13 = scalar_lea.hbm %s3715_s3, 12288 }
   0x2   :  { %s27_s10 = sshll.u32 %s3351_s30, 4  ;;  %p3304_p0 = scmp.ne.s32.totalorder %s3715_s3, %s3303_s13  ;;  %s28_s10 = int_to_ptr.vmem [resolvable:$true] %s27_s10 }
   0x3   :  { %p3307_p1 = scmp.lt.u32.totalorder %s3303_s13, %s3715_s3 }
   0x5   :  { %p3309_p2 = pnand %p3307_p1, %p3304_p0 }
   0x7   :  { %3312 = shalt.err (!%p3309_p2)
}
   0x8   :  { %s3313_s18 = scalar_lea.vmem %s28_s10, 12288  ;;  %p3318_p4 = scmp.lt.s32.totalorder %s28_s10, %s28_s10 }
   0x9   :  { %p3314_p3 = scmp.ne.s32.totalorder %s28_s10, %s3313_s18  ;;  %p3319_p5 = scmp.lt.s32.totalorder %s3313_s18, %s3313_s18 }
   0xb   :  { %p3320_p6 = por %p3319_p5, %p3318_p4 }
   0xd   :  { %p3321_p7 = pnand %p3320_p6, %p3314_p3 }
   0xf   :  { %3324 = shalt.err (!%p3321_p7)
}
  0x10   :  { %s3352_s19 = smov 192   ;;  %s3353_s20 = smov 12  }
  0x11   :  { %33 = dma.hbm_to_vmem [thread:$0]  %s3715_s3, 12288, %s28_s10, [#allocation3], %s3352_s19, %s3352_s19, %s3353_s20  }
  0x12   :  { %s3354_s23 = smov [#allocation4]   ;;  %s3325_s27 = scalar_lea.hbm %s3717_s5, 12288 }
  0x13   :  { %s41_s24 = sshll.u32 %s3354_s23, 4  ;;  %p3326_p8 = scmp.ne.s32.totalorder %s3717_s5, %s3325_s27  ;;  %s42_s24 = int_to_ptr.vmem [resolvable:$true] %s41_s24 }
  0x14   :  { %p3329_p9 = scmp.lt.u32.totalorder %s3325_s27, %s3717_s5 }
  0x16   :  { %p3331_p10 = pnand %p3329_p9, %p3326_p8 }
  0x18   :  { %3334 = shalt.err (!%p3331_p10)
}
  0x19   :  { %s3335_s12 = scalar_lea.vmem %s42_s24, 12288  ;;  %p3340_p12 = scmp.lt.s32.totalorder %s42_s24, %s42_s24 }
  0x1a   :  { %p3336_p11 = scmp.ne.s32.totalorder %s42_s24, %s3335_s12  ;;  %p3341_p13 = scmp.lt.s32.totalorder %s3335_s12, %s3335_s12 }
  0x1c   :  { %p3342_p0 = por %p3341_p13, %p3340_p12 }
  0x1e   :  { %p3343_p1 = pnand %p3342_p0, %p3336_p11 }
  0x20   :  { %3346 = shalt.err (!%p3343_p1)
}
  0x21   :  { %47 = dma.hbm_to_vmem [thread:$0]  %s3717_s5, 12288, %s42_s24, [#allocation5], %s3352_s19, %s3352_s19, %s3353_s20  }
  0x22   :  { %3347 = dma.done.wait [#allocation3], 12288  }
  0x23   :  { %3348 = vsyncadd [#allocation3], 4294955008 }
  0x24   :  { %3349 = dma.done.wait [#allocation5], 12288  }
  0x25   :  { %3350 = vsyncadd [#allocation5], 4294955008  ;;  %v3355_v0 = vmov 0   ;;  %v63_v1 = vld [vmem:[%s3713_s1] sm:$0xff]  ;;  %vm181_vm0 = vcmask 1043456   ;;  %v64_v8 = vld [vmem:[%s3713_s1 + $0x8] sm:$0xff] }
  0x26   :  { %238 = vmatprep.mubr.bf16.mxu1 %v3355_v0  ;;  %v67_v2 = vld [vmem:[%s3713_s1 + $0x20] sm:$0xff]  ;;  %v68_v9 = vld [vmem:[%s3713_s1 + $0x28] sm:$0xff]  ;;  %vm177_vm1 = vcmask 195584   ;;  %v65_v21 = vld [vmem:[%s3713_s1 + $0x10] sm:$0xff]  ;;  %vm2547_vm2 = vcmask 15360  }
  0x27   :  { %v71_v3 = vld [vmem:[%s3713_s1 + $0x40] sm:$0xff]  ;;  %v2556_v4 = vcombine.high %v63_v1, %v67_v2  ;;  %v2555_v5 = vcombine.low %v63_v1, %v67_v2  ;;  %v2558_v12 = vcombine.high %v64_v8, %v68_v9  ;;  %v72_v15 = vld [vmem:[%s3713_s1 + $0x48] sm:$0xff]  ;;  %v2557_v18 = vcombine.low %v64_v8, %v68_v9  ;;  %v69_v23 = vld [vmem:[%s3713_s1 + $0x30] sm:$0xff] }
  0x28   :  { %v2564_v6 = vcombine.high %v71_v3, %v71_v3  ;;  %v2563_v7 = vcombine.low %v71_v3, %v71_v3  ;;  %v61_v10 = vld [vmem:[%s3712_s0] sm:$0xff]  ;;  %v3002_v16 = vld [vmem:[#allocation2 + $0x1c] ss:$12 sps:$4 sm:$0xff]   ;;  %v2566_v19 = vcombine.high %v72_v15, %v72_v15  ;;  %v2565_v20 = vcombine.low %v72_v15, %v72_v15  ;;  %v73_v28 = vld [vmem:[%s3713_s1 + $0x50] sm:$0xff] }
  0x29   :  { %206 = vmatprep.subr.bf16.mxu1 %v2556_v4  ;;  %v2999_v13 = vld [vmem:[#allocation2 + $0x4] ss:$12 sps:$4 sm:$0xff]   ;;  %v3001_v14 = vld [vmem:[#allocation2] ss:$12 sps:$4 sm:$0xff]   ;;  %v3454_v17 = vpack.c.bf16 %v61_v10, %v61_v10  ;;  %v2560_v26 = vcombine.high %v65_v21, %v69_v23  ;;  %v2559_v30 = vcombine.low %v65_v21, %v69_v23  ;;  %v66_v31 = vld [vmem:[%s3713_s1 + $0x18] sm:$0xff]  ;;  %v2568_v33 = vcombine.high %v73_v28, %v73_v28 }
  0x2a   :  { %207 = vmatpush1.bf16.msra.mxu1 %v2555_v5  ;;  %v183_v11 = vsel %vm181_vm0, %v2563_v7, 0  ;;  %1043 = vmatprep.subr.bf16.mxu0 %v2999_v13  ;;  %v3004_v22 = vld [vmem:[#allocation2 + $0x18] ss:$12 sps:$4 sm:$0xff]   ;;  %v3005_v24 = vld [vmem:[#allocation2 + $0x34] ss:$12 sps:$4 sm:$0xff]   ;;  %v189_v25 = vsel %vm181_vm0, %v2565_v20, 0  ;;  %v2567_v34 = vcombine.low %v73_v28, %v73_v28  ;;  %v77_v21 = vlaneseq }
  0x2b   :  { %2571 = vmatprep.subr.msk.bf16.mxu1 %vm181_vm0, %v2564_v6  ;;  %1044 = vmatpush1.bf16.msra.mxu0 %v3001_v14  ;;  %v3007_v27 = vld [vmem:[#allocation2 + $0x30] ss:$12 sps:$4 sm:$0xff]   ;;  %v3008_v29 = vld [vmem:[#allocation2 + $0x4c] ss:$12 sps:$4 sm:$0xff]   ;;  %v3010_v35 = vld [vmem:[#allocation2 + $0x48] ss:$12 sps:$4 sm:$0xff]  }
  0x2c   :  { %1045 = vmatprep.subr.bf16.mxu0 %v3002_v16  ;;  %v70_v32 = vld [vmem:[%s3713_s1 + $0x38] sm:$0xff]  ;;  %v3011_v36 = vld [vmem:[#allocation2 + $0x64] ss:$12 sps:$4 sm:$0xff]   ;;  %v195_v38 = vsel %vm181_vm0, %v2567_v34, 0  ;;  %v3013_v40 = vld [vmem:[#allocation2 + $0x60] ss:$12 sps:$4 sm:$0xff]  }
  0x2d   :  { %v74_v37 = vld [vmem:[%s3713_s1 + $0x58] sm:$0xff]  ;;  %v2562_v39 = vcombine.high %v66_v31, %v70_v32  ;;  %v2561_v42 = vcombine.low %v66_v31, %v70_v32  ;;  %v3017_v46 = vld [vmem:[#allocation2 + $0x94] ss:$12 sps:$4 sm:$0xff]   ;;  %v3023_v53 = vld [vmem:[#allocation2 + $0xc4] ss:$12 sps:$4 sm:$0xff]  }
  0x2e   :  { %209 = vmatpush1.bf16.msra.mxu1 %v183_v11  ;;  %v3014_v41 = vld [vmem:[#allocation2 + $0x7c] ss:$12 sps:$4 sm:$0xff]   ;;  %v2569_v43 = vcombine.low %v74_v37, %v74_v37  ;;  %v2570_v44 = vcombine.high %v74_v37, %v74_v37  ;;  %v3016_v45 = vld [vmem:[#allocation2 + $0x78] ss:$12 sps:$4 sm:$0xff]   ;;  %v3030_v54 = vld [vmem:[#allocation2 + $0xe0] ss:$12 sps:$4 sm:$0xff]  }
  0x2f   :  { %247 = vmatprep.subr.bf16.mxu1 %v2558_v12  ;;  %1046 = vmatpush1.bf16.msra.mxu0 %v3004_v22  ;;  %v3019_v48 = vld [vmem:[#allocation2 + $0x90] ss:$12 sps:$4 sm:$0xff]   ;;  %v3025_v49 = vld [vmem:[#allocation2 + $0xc8] ss:$12 sps:$4 sm:$0xff]   ;;  %v3020_v50 = vld [vmem:[#allocation2 + $0xac] ss:$12 sps:$4 sm:$0xff]  }
  0x30   :  { %1047 = vmatprep.subr.bf16.mxu0 %v3005_v24  ;;  %v201_v47 = vsel %vm181_vm0, %v2569_v43, 0  ;;  %v3022_v51 = vld [vmem:[#allocation2 + $0xa8] ss:$12 sps:$4 sm:$0xff]   ;;  %v3032_v55 = vld [vmem:[#allocation2 + $0x20] ss:$12 sps:$4 sm:$0xff]   ;;  %v3491_v22 = vshrl.u32 %v77_v21, 7 }
  0x31   :  { %2572 = vmatmul.mubr.msk.bf16.vlgmr.msra.gmra.mrb[0].mxu1 %vm177_vm1, %v3454_v17  ;;  %v3027_v52 = vld [vmem:[#allocation2 + $0x8] ss:$12 sps:$4 sm:$0xff]   ;;  %v3026_v56 = vld [vmem:[#allocation2 + $0xc0] ss:$12 sps:$4 sm:$0xff]   ;;  %v3035_v57 = vld [vmem:[#allocation2 + $0xf8] ss:$12 sps:$4 sm:$0xff]  }
  0x32   :  { %248 = vmatpush1.bf16.msra.mxu1 %v2557_v18  ;;  %279 = vmatprep.mubr.bf16.mxu1 %v3355_v0  ;;  %v3028_v58 = vld [vmem:[#allocation2 + $0xdc] ss:$12 sps:$4 sm:$0xff]   ;;  %v3037_v59 = vld [vmem:[#allocation2 + $0x38] ss:$12 sps:$4 sm:$0xff]   ;;  %v3033_v62 = vld [vmem:[#allocation2 + $0xf4] ss:$12 sps:$4 sm:$0xff]  }
  0x33   :  { %2573 = vmatprep.subr.msk.bf16.mxu1 %vm181_vm0, %v2566_v19  ;;  %1048 = vmatpush1.bf16.msra.mxu0 %v3007_v27  ;;  %v3031_v60 = vld [vmem:[#allocation2 + $0xd8] ss:$12 sps:$4 sm:$0xff]   ;;  %v3040_v61 = vld [vmem:[#allocation2 + $0x110] ss:$12 sps:$4 sm:$0xff]   ;;  %v3045_v1 = vld [vmem:[#allocation2 + $0x128] ss:$12 sps:$4 sm:$0xff]  }
  0x34   :  { %1049 = vmatprep.subr.bf16.mxu0 %v3008_v29  ;;  %v3042_v63 = vld [vmem:[#allocation2 + $0x50] ss:$12 sps:$4 sm:$0xff]   ;;  %v3038_v2 = vld [vmem:[#allocation2 + $0x10c] ss:$12 sps:$4 sm:$0xff]   ;;  %v3047_v3 = vld [vmem:[#allocation2 + $0x68] ss:$12 sps:$4 sm:$0xff]  }
  0x35   :  { %v3041_v4 = vld [vmem:[#allocation2 + $0x108] ss:$12 sps:$4 sm:$0xff]   ;;  %v3050_v5 = vld [vmem:[#allocation2 + $0x140] ss:$12 sps:$4 sm:$0xff]   ;;  %v3043_v6 = vld [vmem:[#allocation2 + $0x124] ss:$12 sps:$4 sm:$0xff]  }
  0x36   :  { %250 = vmatpush1.bf16.msra.mxu1 %v189_v25  ;;  %v3052_v7 = vld [vmem:[#allocation2 + $0x80] ss:$12 sps:$4 sm:$0xff]   ;;  %v3048_v9 = vld [vmem:[#allocation2 + $0x13c] ss:$12 sps:$4 sm:$0xff]   ;;  %v3051_v10 = vld [vmem:[#allocation2 + $0x138] ss:$12 sps:$4 sm:$0xff]  }
  0x37   :  { %288 = vmatprep.subr.bf16.mxu1 %v2560_v26  ;;  %1050 = vmatpush1.bf16.msra.mxu0 %v3010_v35  ;;  %v3046_v8 = vld [vmem:[#allocation2 + $0x120] ss:$12 sps:$4 sm:$0xff]   ;;  %v3055_v12 = vld [vmem:[#allocation2 + $0x158] ss:$12 sps:$4 sm:$0xff]   ;;  %v3056_v13 = vld [vmem:[#allocation2 + $0x150] ss:$12 sps:$4 sm:$0xff]  }
  0x38   :  { %1051 = vmatprep.subr.bf16.mxu0 %v3011_v36  ;;  %v3053_v11 = vld [vmem:[#allocation2 + $0x154] ss:$12 sps:$4 sm:$0xff]   ;;  %v3057_v14 = vld [vmem:[#allocation2 + $0x98] ss:$12 sps:$4 sm:$0xff]   ;;  %v3060_v16 = vld [vmem:[#allocation2 + $0x170] ss:$12 sps:$4 sm:$0xff]  }
  0x39   :  { %2574 = vmatmul.mubr.msk.bf16.vlgmr.msra.gmra.mrb[4].mxu1 %vm177_vm1, %v3454_v17  ;;  %v3058_v15 = vld [vmem:[#allocation2 + $0x16c] ss:$12 sps:$4 sm:$0xff]   ;;  %v3062_v18 = vld [vmem:[#allocation2 + $0xb0] ss:$12 sps:$4 sm:$0xff]   ;;  %v3066_v20 = vld [vmem:[#allocation2 + $0x248] ss:$12 sps:$4 sm:$0xff]  }
  0x3a   :  { %289 = vmatpush1.bf16.msra.mxu1 %v2559_v30  ;;  %320 = vmatprep.mubr.bf16.mxu1 %v3355_v0  ;;  %v3065_v19 = vld [vmem:[#allocation2 + $0x184] ss:$12 sps:$4 sm:$0xff]   ;;  %v3494_v23 = vsub.s32 0, %v3491_v22  ;;  %v3502_v25 = vsub.s32 1, %v3491_v22  ;;  %v3071_v43 = vld [vmem:[#allocation2 + $0x260] ss:$12 sps:$4 sm:$0xff]  }
  0x3b   :  { %2575 = vmatprep.subr.msk.bf16.mxu1 %vm181_vm0, %v2568_v33  ;;  %1052 = vmatpush1.bf16.msra.mxu0 %v3013_v40  ;;  %v3499_v24 = vld [vmem:[%s3714_s2] sm:$0xff]  ;;  %v91_v33 = vsub.s32 3, %v3491_v22 }
  0x3c   :  { %1053 = vmatprep.subr.bf16.mxu0 %v3014_v41  ;;  %v80_v26 = vrot.slane %v3499_v24, %v3494_v23  ;;  %v84_v27 = vrot.slane %v3499_v24, %v3502_v25  ;;  %v3097_v21 = vld [vmem:[#allocation2 + $0x218] ss:$12 sps:$4 sm:$0xff]  }
  0x3d   :  { %v92_v40 = vrot.slane %v3499_v24, %v91_v33  ;;  %v3108_v33 = vld [vmem:[#allocation4 + $0x4] ss:$12 sps:$4 sm:$0xff]  }
  0x3e   :  { %291 = vmatpush1.bf16.msra.mxu1 %v195_v38  ;;  %v3063_v38 = vld [vmem:[#allocation2 + $0x180] ss:$12 sps:$4 sm:$0xff]  }
  0x3f   :  { %329 = vmatprep.subr.bf16.mxu1 %v2562_v39  ;;  %1054 = vmatpush1.bf16.msra.mxu0 %v3016_v45  ;;  %v3067_v39 = vld [vmem:[#allocation2 + $0x188] ss:$12 sps:$4 sm:$0xff]  }
  0x40   :  { %1055 = vmatprep.subr.bf16.mxu0 %v3017_v46  ;;  %v3068_v46 = vld [vmem:[#allocation2 + $0x198] ss:$12 sps:$4 sm:$0xff]  }
  0x41   :  { %2576 = vmatmul.mubr.msk.bf16.vlgmr.msra.gmra.mrb[8].mxu1 %vm177_vm1, %v3454_v17 }
  0x42   :  { %330 = vmatpush1.bf16.msra.mxu1 %v2561_v42  ;;  %361 = vmatprep.mubr.bf16.mxu1 %v3355_v0  ;;  %v3036_v0 = vld [vmem:[#allocation2 + $0xf0] ss:$12 sps:$4 sm:$0xff]  }
  0x43   :  { %2577 = vmatprep.subr.msk.bf16.mxu1 %vm181_vm0, %v2570_v44  ;;  %1056 = vmatpush1.bf16.msra.mxu0 %v3019_v48  ;;  %v3070_v42 = vld [vmem:[#allocation2 + $0x19c] ss:$12 sps:$4 sm:$0xff]  }
  0x44   :  { %1057 = vmatprep.subr.bf16.mxu0 %v3020_v50  ;;  %v3075_v50 = vld [vmem:[#allocation2 + $0x1b4] ss:$12 sps:$4 sm:$0xff]  }
  0x46   :  { %332 = vmatpush1.bf16.msra.mxu1 %v201_v47  ;;  %v3072_v47 = vld [vmem:[#allocation2 + $0x1a0] ss:$12 sps:$4 sm:$0xff]  }
  0x47   :  { %2820 = vmatprep.subr.bf16.mxu1 %v3025_v49  ;;  %1058 = vmatpush1.bf16.msra.mxu0 %v3022_v51  ;;  %v3076_v51 = vld [vmem:[#allocation2 + $0x278] ss:$12 sps:$4 sm:$0xff]  }
  0x48   :  { %1059 = vmatprep.subr.bf16.mxu0 %v3023_v53 }
  0x49   :  { %2578 = vmatmul.mubr.msk.bf16.vlgmr.msra.gmra.mrb[12].mxu1 %vm177_vm1, %v3454_v17  ;;  %v3061_v17 = vld [vmem:[#allocation2 + $0x168] ss:$12 sps:$4 sm:$0xff]  }
  0x4a   :  { %2821 = vmatpush3.bf16.msra.mxu1 %v3027_v52 }
  0x4b   :  { %2822 = vmatprep.subr.bf16.mxu1 %v3030_v54  ;;  %1060 = vmatpush1.bf16.msra.mxu0 %v3026_v56  ;;  %v3073_v54 = vld [vmem:[#allocation2 + $0x1b0] ss:$12 sps:$4 sm:$0xff]  }
  0x4c   :  { %1061 = vmatprep.subr.bf16.mxu0 %v3028_v58  ;;  %v3081_v58 = vld [vmem:[#allocation2 + $0x290] ss:$12 sps:$4 sm:$0xff]  }
  0x4e   :  { %2823 = vmatpush3.bf16.msra.mxu1 %v3032_v55  ;;  %v3077_v55 = vld [vmem:[#allocation2 + $0x1b8] ss:$12 sps:$4 sm:$0xff]  }
  0x4f   :  { %2824 = vmatprep.subr.bf16.mxu1 %v3035_v57  ;;  %1062 = vmatpush1.bf16.msra.mxu0 %v3031_v60  ;;  %v3080_v57 = vld [vmem:[#allocation2 + $0x1cc] ss:$12 sps:$4 sm:$0xff]  }
  0x50   :  { %1063 = vmatprep.subr.bf16.mxu0 %v3033_v62  ;;  %v3082_v62 = vld [vmem:[#allocation2 + $0x1d0] ss:$12 sps:$4 sm:$0xff]  }
  0x52   :  { %2825 = vmatpush3.bf16.msra.mxu1 %v3037_v59 }
  0x53   :  { %2826 = vmatprep.subr.bf16.mxu1 %v3040_v61  ;;  %1064 = vmatpush1.bf16.msra.mxu0 %v3036_v0  ;;  %v3078_v61 = vld [vmem:[#allocation2 + $0x1c8] ss:$12 sps:$4 sm:$0xff]   ;;  %v3085_v0 = vld [vmem:[#allocation2 + $0x1e4] ss:$12 sps:$4 sm:$0xff]  }
  0x54   :  { %1065 = vmatprep.subr.bf16.mxu0 %v3038_v2 }
  0x56   :  { %2827 = vmatpush3.bf16.msra.mxu1 %v3042_v63 }
  0x57   :  { %2828 = vmatprep.subr.bf16.mxu1 %v3045_v1  ;;  %1066 = vmatpush1.bf16.msra.mxu0 %v3041_v4  ;;  %v3086_v1 = vld [vmem:[#allocation2 + $0x2a8] ss:$12 sps:$4 sm:$0xff]   ;;  %v3083_v4 = vld [vmem:[#allocation2 + $0x1e0] ss:$12 sps:$4 sm:$0xff]  }
  0x58   :  { %1067 = vmatprep.subr.bf16.mxu0 %v3043_v6  ;;  %v3090_v6 = vld [vmem:[#allocation2 + $0x1fc] ss:$12 sps:$4 sm:$0xff]  }
  0x5a   :  { %2829 = vmatpush3.bf16.msra.mxu1 %v3047_v3  ;;  %v3515_v3 = vsub.s32 2, %v3491_v22 }
  0x5b   :  { %2830 = vmatprep.subr.bf16.mxu1 %v3050_v5  ;;  %1068 = vmatpush1.bf16.msra.mxu0 %v3046_v8  ;;  %v3087_v5 = vld [vmem:[#allocation2 + $0x1e8] ss:$12 sps:$4 sm:$0xff]   ;;  %v99_v8 = vsub.s32 5, %v3491_v22 }
  0x5c   :  { %1069 = vmatprep.subr.bf16.mxu0 %v3048_v9 }
  0x5e   :  { %2831 = vmatpush3.bf16.msra.mxu1 %v3052_v7  ;;  %v3091_v7 = vld [vmem:[#allocation2 + $0x2c0] ss:$12 sps:$4 sm:$0xff]  }
  0x5f   :  { %1070 = vmatpush1.bf16.msra.mxu0 %v3051_v10  ;;  %2832 = vmatprep.subr.bf16.mxu1 %v3055_v12  ;;  %v88_v10 = vrot.slane %v3499_v24, %v3515_v3  ;;  %v3088_v12 = vld [vmem:[#allocation2 + $0x1f8] ss:$12 sps:$4 sm:$0xff]  }
  0x60   :  { %1071 = vmatprep.subr.bf16.mxu0 %v3053_v11 }
  0x62   :  { %2833 = vmatpush3.bf16.msra.mxu1 %v3057_v14 }
  0x63   :  { %1072 = vmatpush1.bf16.msra.mxu0 %v3056_v13  ;;  %2834 = vmatprep.subr.bf16.mxu1 %v3060_v16  ;;  %v3092_v13 = vld [vmem:[#allocation2 + $0x200] ss:$12 sps:$4 sm:$0xff]   ;;  %v3096_v16 = vld [vmem:[#allocation2 + $0x2d8] ss:$12 sps:$4 sm:$0xff]  }
  0x64   :  { %1073 = vmatprep.subr.bf16.mxu0 %v3058_v15  ;;  %v3095_v15 = vld [vmem:[#allocation2 + $0x214] ss:$12 sps:$4 sm:$0xff]  }
  0x66   :  { %2835 = vmatpush3.bf16.msra.mxu1 %v3062_v18  ;;  %v100_v18 = vrot.slane %v3499_v24, %v99_v8  ;;  %v3155_v8 = vld [vmem:[#allocation4 + $0x8] ss:$12 sps:$4 sm:$0xff]  }
  0x67   :  { %1074 = vmatpush1.bf16.msra.mxu0 %v3061_v17  ;;  %2842 = vmatprep.subr.bf16.mxu1 %v3066_v20  ;;  %v3093_v20 = vld [vmem:[#allocation2 + $0x210] ss:$12 sps:$4 sm:$0xff]  }
  0x68   :  { %1084 = vmatprep.subr.bf16.mxu0 %v3065_v19 }
 0x104   :  { %v240_v28 = vpop.f32.mrb[0].mxu1 }
 0x105   :  { %v241_v29 = vadd.f32 %v240_v28, %v80_v26  ;;  %v242_v30 = vpop.f32.mrb[1].mxu1  ;;  %v3100_v26 = vld [vmem:[#allocation2 + $0x22c] ss:$12 sps:$4 sm:$0xff]  }
 0x106   :  { %v243_v31 = vadd.f32 %v242_v30, %v84_v27  ;;  %v244_v32 = vpop.f32.mrb[2].mxu1  ;;  %v3101_v27 = vld [vmem:[#allocation2 + $0x2f0] ss:$12 sps:$4 sm:$0xff]   ;;  %v3098_v30 = vld [vmem:[#allocation2 + $0x228] ss:$12 sps:$4 sm:$0xff]  }
 0x107   :  { %v370_v34 = vmax.f32 %v241_v29, 0.0  ;;  %v245_v35 = vpop.f32.mrb[3].mxu1  ;;  %v3105_v32 = vld [vmem:[#allocation2 + $0x244] ss:$12 sps:$4 sm:$0xff]  }
 0x108   :  { %v371_v36 = vmax.f32 %v243_v31, 0.0  ;;  %v3102_v31 = vld [vmem:[#allocation2 + $0x230] ss:$12 sps:$4 sm:$0xff]  }
 0x109   :  { %v378_v41 = vpack.c.bf16 %v370_v34, %v370_v34 }
 0x10a   :  { %v379_v37 = vpack.c.bf16 %v371_v36, %v371_v36  ;;  %v3103_v36 = vld [vmem:[#allocation2 + $0x240] ss:$12 sps:$4 sm:$0xff]  }
 0x10c   :  { %1075 = vmatprep.mubr.bf16.mxu0 %v379_v37  ;;  %1157 = vmatprep.mubr.bf16.mxu1 %v379_v37  ;;  %v3510_v44 = vpop.f32.mrb[4].mxu1  ;;  %v3106_v37 = vld [vmem:[#allocation4] ss:$12 sps:$4 sm:$0xff]  }
 0x10d   :  { %1076 = vmatmul.mubr.bf16.vlgmr.msra.gmra.mrb[0].mxu0 %v378_v41  ;;  %1158 = vmatmul.mubr.bf16.vlgmr.msra.gmra.mrb[16].mxu1 %v378_v41  ;;  %v283_v45 = vpop.f32.mrb[5].mxu1  ;;  %v282_v19 = vadd.f32 %v3510_v44, %v88_v10  ;;  %v3109_v41 = vld [vmem:[#allocation2 + $0x258] ss:$12 sps:$4 sm:$0xff]   ;;  %v3120_v44 = vld [vmem:[#allocation4 + $0x34] ss:$12 sps:$4 sm:$0xff]  }
 0x10e   :  { %1085 = vmatpush1.bf16.msra.mxu0 %v3063_v38  ;;  %2843 = vmatpush3.bf16.msra.mxu1 %v3067_v39  ;;  %v284_v48 = vadd.f32 %v283_v45, %v92_v40  ;;  %v285_v49 = vpop.f32.mrb[6].mxu1  ;;  %v3111_v38 = vld [vmem:[#allocation2 + $0x25c] ss:$12 sps:$4 sm:$0xff]  }
 0x10f   :  { %1086 = vmatprep.subr.bf16.mxu0 %v3070_v42  ;;  %2844 = vmatprep.subr.bf16.mxu1 %v3071_v43  ;;  %v286_v52 = vpop.f32.mrb[7].mxu1  ;;  %v372_v29 = vmax.f32 %v282_v19, 0.0  ;;  %v3114_v39 = vld [vmem:[#allocation4 + $0x1c] ss:$12 sps:$4 sm:$0xff]   ;;  %v3112_v42 = vld [vmem:[#allocation4 + $0x18] ss:$12 sps:$4 sm:$0xff]  }
 0x110   :  { %v373_v53 = vmax.f32 %v284_v48, 0.0  ;;  %v3117_v43 = vld [vmem:[#allocation2 + $0x274] ss:$12 sps:$4 sm:$0xff]   ;;  %v3115_v45 = vld [vmem:[#allocation2 + $0x270] ss:$12 sps:$4 sm:$0xff]  }
 0x111   :  { %v3526_v35 = vpack.c.bf16 %v372_v29, %v372_v29  ;;  %v3126_v48 = vld [vmem:[#allocation4 + $0x4c] ss:$12 sps:$4 sm:$0xff]   ;;  %v3121_v49 = vld [vmem:[#allocation2 + $0x288] ss:$12 sps:$4 sm:$0xff]   ;;  %v3132_v52 = vld [vmem:[#allocation4 + $0x64] ss:$12 sps:$4 sm:$0xff]  }
 0x112   :  { %1087 = vmatpush1.bf16.msra.mxu0 %v3068_v46  ;;  %2845 = vmatpush3.bf16.msra.mxu1 %v3072_v47  ;;  %v381_v56 = vpack.c.bf16 %v373_v53, %v373_v53  ;;  %v3118_v46 = vld [vmem:[#allocation4 + $0x30] ss:$12 sps:$4 sm:$0xff]   ;;  %v3123_v47 = vld [vmem:[#allocation2 + $0x28c] ss:$12 sps:$4 sm:$0xff]   ;;  %v95_v29 = vsub.s32 4, %v3491_v22 }
 0x113   :  { %1088 = vmatprep.subr.bf16.mxu0 %v3075_v50  ;;  %2846 = vmatprep.subr.bf16.mxu1 %v3076_v51  ;;  %v3124_v50 = vld [vmem:[#allocation4 + $0x48] ss:$12 sps:$4 sm:$0xff]   ;;  %v3129_v51 = vld [vmem:[#allocation2 + $0x2a4] ss:$12 sps:$4 sm:$0xff]   ;;  %v3127_v53 = vld [vmem:[#allocation2 + $0x2a0] ss:$12 sps:$4 sm:$0xff]  }
 0x114   :  { %1116 = vmatprep.mubr.bf16.mxu0 %v381_v56  ;;  %1197 = vmatprep.mubr.bf16.mxu1 %v381_v56  ;;  %v3512_v59 = vpop.f32.mrb[8].mxu1  ;;  %v3138_v56 = vld [vmem:[#allocation4 + $0x7c] ss:$12 sps:$4 sm:$0xff]   ;;  %v3168_v19 = vld [vmem:[#allocation4 + $0x10c] ss:$12 sps:$4 sm:$0xff]  }
 0x115   :  { %v324_v60 = vpop.f32.mrb[9].mxu1  ;;  %v3158_v10 = vld [vmem:[#allocation4 + $0xdc] ss:$12 sps:$4 sm:$0xff]  }
 0x116   :  { %1089 = vmatpush1.bf16.msra.mxu0 %v3073_v54  ;;  %2847 = vmatpush3.bf16.msra.mxu1 %v3077_v55  ;;  %v326_v63 = vpop.f32.mrb[10].mxu1  ;;  %v325_v28 = vadd.f32 %v324_v60, %v100_v18  ;;  %v3130_v54 = vld [vmem:[#allocation4 + $0x60] ss:$12 sps:$4 sm:$0xff]   ;;  %v3135_v55 = vld [vmem:[#allocation2 + $0x2bc] ss:$12 sps:$4 sm:$0xff]  }
 0x117   :  { %1090 = vmatprep.subr.bf16.mxu0 %v3080_v57  ;;  %2848 = vmatprep.subr.bf16.mxu1 %v3081_v58  ;;  %v327_v2 = vpop.f32.mrb[11].mxu1  ;;  %v3133_v57 = vld [vmem:[#allocation2 + $0x2b8] ss:$12 sps:$4 sm:$0xff]   ;;  %v3141_v60 = vld [vmem:[#allocation2 + $0x2d4] ss:$12 sps:$4 sm:$0xff]  }
 0x118   :  { %v375_v34 = vmax.f32 %v325_v28, 0.0  ;;  %v3136_v58 = vld [vmem:[#allocation4 + $0x78] ss:$12 sps:$4 sm:$0xff]   ;;  %v3142_v63 = vld [vmem:[#allocation4 + $0x90] ss:$12 sps:$4 sm:$0xff]  }
 0x119   :  { %v3145_v2 = vld [vmem:[#allocation2 + $0x2e8] ss:$12 sps:$4 sm:$0xff]   ;;  %v3165_v18 = vld [vmem:[#allocation4 + $0x38] ss:$12 sps:$4 sm:$0xff]  }
 0x11a   :  { %1091 = vmatpush1.bf16.msra.mxu0 %v3078_v61  ;;  %2849 = vmatpush3.bf16.msra.mxu1 %v3082_v62  ;;  %v3528_v40 = vpack.c.bf16 %v375_v34, %v375_v34  ;;  %v3144_v61 = vld [vmem:[#allocation4 + $0x94] ss:$12 sps:$4 sm:$0xff]   ;;  %v3139_v62 = vld [vmem:[#allocation2 + $0x2d0] ss:$12 sps:$4 sm:$0xff]   ;;  %v107_v34 = vsub.s32 7, %v3491_v22 }
 0x11b   :  { %1092 = vmatprep.subr.bf16.mxu0 %v3085_v0  ;;  %2850 = vmatprep.subr.bf16.mxu1 %v3086_v1  ;;  %v3147_v0 = vld [vmem:[#allocation2 + $0x2ec] ss:$12 sps:$4 sm:$0xff]   ;;  %v3174_v28 = vld [vmem:[#allocation4 + $0x128] ss:$12 sps:$4 sm:$0xff]  }
 0x11c   :  { %v3518_v9 = vpop.f32.mrb[12].mxu1  ;;  %v3150_v1 = vld [vmem:[#allocation4 + $0xac] ss:$12 sps:$4 sm:$0xff]  }
 0x11d   :  { %v3522_v11 = vpop.f32.mrb[13].mxu1 }
 0x11e   :  { %1093 = vmatpush1.bf16.msra.mxu0 %v3083_v4  ;;  %2851 = vmatpush3.bf16.msra.mxu1 %v3087_v5  ;;  %v367_v14 = vpop.f32.mrb[14].mxu1  ;;  %v3148_v4 = vld [vmem:[#allocation4 + $0xa8] ss:$12 sps:$4 sm:$0xff]   ;;  %v3153_v5 = vld [vmem:[#allocation4 + $0xc4] ss:$12 sps:$4 sm:$0xff]  }
 0x11f   :  { %1094 = vmatprep.subr.bf16.mxu0 %v3090_v6  ;;  %2852 = vmatprep.subr.bf16.mxu1 %v3091_v7  ;;  %v368_v17 = vpop.f32.mrb[15].mxu1  ;;  %v3154_v6 = vld [vmem:[#allocation4 + $0xc8] ss:$12 sps:$4 sm:$0xff]   ;;  %v3151_v7 = vld [vmem:[#allocation4 + $0xc0] ss:$12 sps:$4 sm:$0xff]  }
 0x120   :  { %v3160_v14 = vld [vmem:[#allocation4 + $0x20] ss:$12 sps:$4 sm:$0xff]   ;;  %v3161_v17 = vld [vmem:[#allocation4 + $0xf0] ss:$12 sps:$4 sm:$0xff]  }
 0x122   :  { %1095 = vmatpush1.bf16.msra.mxu0 %v3088_v12  ;;  %2853 = vmatpush3.bf16.msra.mxu1 %v3092_v13  ;;  %v3159_v12 = vld [vmem:[#allocation4 + $0xe0] ss:$12 sps:$4 sm:$0xff]   ;;  %v3156_v13 = vld [vmem:[#allocation4 + $0xd8] ss:$12 sps:$4 sm:$0xff]  }
 0x123   :  { %1096 = vmatprep.subr.bf16.mxu0 %v3095_v15  ;;  %2854 = vmatprep.subr.bf16.mxu1 %v3096_v16  ;;  %v3163_v15 = vld [vmem:[#allocation4 + $0xf4] ss:$12 sps:$4 sm:$0xff]   ;;  %v3164_v16 = vld [vmem:[#allocation4 + $0xf8] ss:$12 sps:$4 sm:$0xff]  }
 0x126   :  { %1097 = vmatpush1.bf16.msra.mxu0 %v3093_v20  ;;  %2855 = vmatpush3.bf16.msra.mxu1 %v3097_v21  ;;  %v3169_v20 = vld [vmem:[#allocation4 + $0x110] ss:$12 sps:$4 sm:$0xff]   ;;  %v3166_v21 = vld [vmem:[#allocation4 + $0x108] ss:$12 sps:$4 sm:$0xff]  }
 0x127   :  { %1098 = vmatprep.subr.bf16.mxu0 %v3100_v26  ;;  %2856 = vmatprep.subr.bf16.mxu1 %v3101_v27  ;;  %v3170_v26 = vld [vmem:[#allocation4 + $0x50] ss:$12 sps:$4 sm:$0xff]  }
 0x128   :  { %v3173_v27 = vld [vmem:[#allocation4 + $0x124] ss:$12 sps:$4 sm:$0xff]  }
 0x12a   :  { %1099 = vmatpush1.bf16.msra.mxu0 %v3098_v30  ;;  %2857 = vmatpush3.bf16.msra.mxu1 %v3102_v31  ;;  %v3171_v30 = vld [vmem:[#allocation4 + $0x120] ss:$12 sps:$4 sm:$0xff]   ;;  %v3175_v31 = vld [vmem:[#allocation4 + $0x68] ss:$12 sps:$4 sm:$0xff]  }
 0x12b   :  { %1100 = vmatprep.subr.bf16.mxu0 %v3105_v32  ;;  %1868 = vmatprep.subr.bf16.mxu1 %v3108_v33  ;;  %v3178_v32 = vld [vmem:[#allocation4 + $0x13c] ss:$12 sps:$4 sm:$0xff]   ;;  %v3179_v33 = vld [vmem:[#allocation4 + $0x140] ss:$12 sps:$4 sm:$0xff]  }
 0x12d   :  { %1198 = vmatmul.mubr.bf16.vlgmr.msra.gmra.mrb[20].mxu1 %v3526_v35 }
 0x12e   :  { %1101 = vmatpush1.bf16.msra.mxu0 %v3103_v36  ;;  %1869 = vmatpush1.bf16.msra.mxu1 %v3106_v37  ;;  %v3176_v36 = vld [vmem:[#allocation4 + $0x138] ss:$12 sps:$4 sm:$0xff]   ;;  %v3180_v37 = vld [vmem:[#allocation4 + $0x80] ss:$12 sps:$4 sm:$0xff]  }
 0x12f   :  { %1102 = vmatprep.subr.bf16.mxu0 %v3111_v38  ;;  %1870 = vmatprep.subr.bf16.mxu1 %v3114_v39  ;;  %v3183_v38 = vld [vmem:[#allocation4 + $0x154] ss:$12 sps:$4 sm:$0xff]   ;;  %v3184_v39 = vld [vmem:[#allocation4 + $0x158] ss:$12 sps:$4 sm:$0xff]  }
 0x130   :  { %1900 = vmatprep.mubr.bf16.mxu1 %v3528_v40 }
 0x132   :  { %1103 = vmatpush1.bf16.msra.mxu0 %v3109_v41  ;;  %1871 = vmatpush1.bf16.msra.mxu1 %v3112_v42  ;;  %v3181_v42 = vld [vmem:[#allocation4 + $0x150] ss:$12 sps:$4 sm:$0xff]  }
 0x133   :  { %1104 = vmatprep.subr.bf16.mxu0 %v3117_v43  ;;  %1872 = vmatprep.subr.bf16.mxu1 %v3120_v44  ;;  %v3185_v43 = vld [vmem:[#allocation4 + $0x98] ss:$12 sps:$4 sm:$0xff]  }
 0x134   :  { %v3188_v44 = vld [vmem:[#allocation4 + $0x16c] ss:$12 sps:$4 sm:$0xff]  }
 0x136   :  { %1105 = vmatpush1.bf16.msra.mxu0 %v3115_v45  ;;  %1873 = vmatpush1.bf16.msra.mxu1 %v3118_v46  ;;  %v3189_v45 = vld [vmem:[#allocation4 + $0x170] ss:$12 sps:$4 sm:$0xff]  }
 0x137   :  { %1106 = vmatprep.subr.bf16.mxu0 %v3123_v47  ;;  %1874 = vmatprep.subr.bf16.mxu1 %v3126_v48  ;;  %v3186_v48 = vld [vmem:[#allocation4 + $0x168] ss:$12 sps:$4 sm:$0xff]  }
 0x13a   :  { %1107 = vmatpush1.bf16.msra.mxu0 %v3121_v49  ;;  %1875 = vmatpush1.bf16.msra.mxu1 %v3124_v50  ;;  %v3190_v49 = vld [vmem:[#allocation4 + $0xb0] ss:$12 sps:$4 sm:$0xff]  }
 0x13b   :  { %1108 = vmatprep.subr.bf16.mxu0 %v3129_v51  ;;  %1876 = vmatprep.subr.bf16.mxu1 %v3132_v52  ;;  %v3193_v50 = vld [vmem:[#allocation4 + $0x184] ss:$12 sps:$4 sm:$0xff]   ;;  %v3194_v51 = vld [vmem:[#allocation4 + $0x248] ss:$12 sps:$4 sm:$0xff]  }
 0x13e   :  { %1109 = vmatpush1.bf16.msra.mxu0 %v3127_v53  ;;  %1877 = vmatpush1.bf16.msra.mxu1 %v3130_v54  ;;  %v3191_v53 = vld [vmem:[#allocation4 + $0x180] ss:$12 sps:$4 sm:$0xff]   ;;  %v3195_v54 = vld [vmem:[#allocation4 + $0x188] ss:$12 sps:$4 sm:$0xff]  }
 0x13f   :  { %1110 = vmatprep.subr.bf16.mxu0 %v3135_v55  ;;  %1878 = vmatprep.subr.bf16.mxu1 %v3138_v56  ;;  %v3198_v55 = vld [vmem:[#allocation4 + $0x19c] ss:$12 sps:$4 sm:$0xff]   ;;  %v3199_v56 = vld [vmem:[#allocation4 + $0x260] ss:$12 sps:$4 sm:$0xff]  }
 0x142   :  { %1111 = vmatpush1.bf16.msra.mxu0 %v3133_v57  ;;  %1879 = vmatpush1.bf16.msra.mxu1 %v3136_v58  ;;  %v3196_v57 = vld [vmem:[#allocation4 + $0x198] ss:$12 sps:$4 sm:$0xff]   ;;  %v3200_v58 = vld [vmem:[#allocation4 + $0x1a0] ss:$12 sps:$4 sm:$0xff]  }
 0x143   :  { %1112 = vmatprep.subr.bf16.mxu0 %v3141_v60  ;;  %1880 = vmatprep.subr.bf16.mxu1 %v3144_v61  ;;  %v3203_v60 = vld [vmem:[#allocation4 + $0x1b4] ss:$12 sps:$4 sm:$0xff]   ;;  %v3204_v61 = vld [vmem:[#allocation4 + $0x278] ss:$12 sps:$4 sm:$0xff]  }
 0x146   :  { %1113 = vmatpush1.bf16.msra.mxu0 %v3139_v62  ;;  %1881 = vmatpush1.bf16.msra.mxu1 %v3142_v63  ;;  %v3201_v62 = vld [vmem:[#allocation4 + $0x1b0] ss:$12 sps:$4 sm:$0xff]   ;;  %v3205_v63 = vld [vmem:[#allocation4 + $0x1b8] ss:$12 sps:$4 sm:$0xff]  }
 0x147   :  { %1114 = vmatprep.subr.bf16.mxu0 %v3147_v0  ;;  %1882 = vmatprep.subr.bf16.mxu1 %v3150_v1  ;;  %v3208_v0 = vld [vmem:[#allocation4 + $0x1cc] ss:$12 sps:$4 sm:$0xff]   ;;  %v3209_v1 = vld [vmem:[#allocation4 + $0x290] ss:$12 sps:$4 sm:$0xff]  }
 0x14a   :  { %1115 = vmatpush1.bf16.msra.mxu0 %v3145_v2  ;;  %1883 = vmatpush1.bf16.msra.mxu1 %v3148_v4  ;;  %v3206_v2 = vld [vmem:[#allocation4 + $0x1c8] ss:$12 sps:$4 sm:$0xff]   ;;  %v3210_v4 = vld [vmem:[#allocation4 + $0x1d0] ss:$12 sps:$4 sm:$0xff]  }
 0x14b   :  { %1884 = vmatprep.subr.bf16.mxu1 %v3153_v5  ;;  %2864 = vmatprep.subr.bf16.mxu0 %v3154_v6  ;;  %v3213_v5 = vld [vmem:[#allocation4 + $0x1e4] ss:$12 sps:$4 sm:$0xff]   ;;  %v3214_v6 = vld [vmem:[#allocation4 + $0x2a8] ss:$12 sps:$4 sm:$0xff]  }
 0x14d   :  { %1117 = vmatmul.mubr.bf16.vlgmr.msra.gmra.mrb[0].mxu0 %v3526_v35  ;;  %v96_v35 = vrot.slane %v3499_v24, %v95_v29  ;;  %v3233_v29 = vld [vmem:[#allocation4 + $0x244] ss:$12 sps:$4 sm:$0xff]  }
 0x14e   :  { %1885 = vmatpush1.bf16.msra.mxu1 %v3151_v7  ;;  %2865 = vmatpush3.bf16.msra.mxu0 %v3155_v8  ;;  %v103_v7 = vsub.s32 6, %v3491_v22  ;;  %v3211_v8 = vld [vmem:[#allocation4 + $0x1e0] ss:$12 sps:$4 sm:$0xff]  }
 0x14f   :  { %1886 = vmatprep.subr.bf16.mxu1 %v3158_v10  ;;  %2866 = vmatprep.subr.bf16.mxu0 %v3159_v12  ;;  %v323_v41 = vadd.f32 %v3512_v59, %v96_v35  ;;  %v3215_v10 = vld [vmem:[#allocation4 + $0x1e8] ss:$12 sps:$4 sm:$0xff]   ;;  %v3234_v35 = vld [vmem:[#allocation4 + $0x258] ss:$12 sps:$4 sm:$0xff]  }
 0x150   :  { %1982 = vmatprep.mubr.bf16.mxu0 %v3528_v40  ;;  %v108_v40 = vrot.slane %v3499_v24, %v107_v34  ;;  %v3218_v12 = vld [vmem:[#allocation4 + $0x1fc] ss:$12 sps:$4 sm:$0xff]  }
 0x151   :  { %v374_v47 = vmax.f32 %v323_v41, 0.0  ;;  %v3257_v34 = vld [vmem:[%s3719_s7 + $0x48] sm:$0xff]  }
 0x152   :  { %1887 = vmatpush1.bf16.msra.mxu1 %v3156_v13  ;;  %2867 = vmatpush3.bf16.msra.mxu0 %v3160_v14  ;;  %v366_v46 = vadd.f32 %v3522_v11, %v108_v40  ;;  %v3219_v13 = vld [vmem:[#allocation4 + $0x2c0] ss:$12 sps:$4 sm:$0xff]   ;;  %v104_v14 = vrot.slane %v3499_v24, %v103_v7  ;;  %v3226_v24 = vld [vmem:[#allocation4 + $0x228] ss:$12 sps:$4 sm:$0xff]  }
 0x153   :  { %1888 = vmatprep.subr.bf16.mxu1 %v3163_v15  ;;  %2868 = vmatprep.subr.bf16.mxu0 %v3164_v16  ;;  %v382_v52 = vpack.c.bf16 %v374_v47, %v374_v47  ;;  %v3216_v15 = vld [vmem:[#allocation4 + $0x1f8] ss:$12 sps:$4 sm:$0xff]   ;;  %v3220_v16 = vld [vmem:[#allocation4 + $0x200] ss:$12 sps:$4 sm:$0xff]   ;;  %v3260_v40 = vld [vmem:[%s3719_s7 + $0x10] sm:$0xff]  }
 0x154   :  { %v377_v59 = vmax.f32 %v366_v46, 0.0  ;;  %v364_v22 = vadd.f32 %v3518_v9, %v104_v14  ;;  %v3255_v9 = vld [vmem:[%s3719_s7 + $0x40] sm:$0xff]   ;;  %v3242_v41 = vld [vmem:[#allocation4 + $0x28c] ss:$12 sps:$4 sm:$0xff]  }
 0x155   :  { %v3263_v46 = vld [vmem:[%s3719_s7 + $0x60] sm:$0xff]   ;;  %v3283_v14 = vld [vmem:[%s3719_s7 + $0xd8] sm:$0xff]  }
 0x156   :  { %1889 = vmatpush1.bf16.msra.mxu1 %v3161_v17  ;;  %2869 = vmatpush3.bf16.msra.mxu0 %v3165_v18  ;;  %v385_v11 = vpack.c.bf16 %v377_v59, %v377_v59  ;;  %v3223_v17 = vld [vmem:[#allocation4 + $0x214] ss:$12 sps:$4 sm:$0xff]   ;;  %v3224_v18 = vld [vmem:[#allocation4 + $0x2d8] ss:$12 sps:$4 sm:$0xff]   ;;  %v3266_v59 = vld [vmem:[%s3719_s7 + $0x28] sm:$0xff]  }
 0x157   :  { %1890 = vmatprep.subr.bf16.mxu1 %v3168_v19  ;;  %2870 = vmatprep.subr.bf16.mxu0 %v3169_v20  ;;  %v3221_v19 = vld [vmem:[#allocation4 + $0x210] ss:$12 sps:$4 sm:$0xff]   ;;  %v3225_v20 = vld [vmem:[#allocation4 + $0x218] ss:$12 sps:$4 sm:$0xff]   ;;  %v3243_v47 = vld [vmem:[#allocation4 + $0x2a0] ss:$12 sps:$4 sm:$0xff]  }
 0x158   :  { %v3273_v7 = vld [vmem:[%s3719_s7 + $0x80] sm:$0xff]  }
 0x15a   :  { %1891 = vmatpush1.bf16.msra.mxu1 %v3166_v21  ;;  %2871 = vmatpush3.bf16.msra.mxu0 %v3170_v26  ;;  %v3228_v21 = vld [vmem:[#allocation4 + $0x22c] ss:$12 sps:$4 sm:$0xff]   ;;  %v3229_v26 = vld [vmem:[#allocation4 + $0x2f0] ss:$12 sps:$4 sm:$0xff]  }
 0x15b   :  { %1892 = vmatprep.subr.bf16.mxu1 %v3173_v27  ;;  %2872 = vmatprep.subr.bf16.mxu0 %v3174_v28  ;;  %v376_v27 = vmax.f32 %v364_v22, 0.0  ;;  %v3230_v28 = vld [vmem:[#allocation4 + $0x230] ss:$12 sps:$4 sm:$0xff]   ;;  %v3293_v22 = vld [vmem:[%s3719_s7 + $0xa8] sm:$0xff]  }
 0x15e   :  { %1893 = vmatpush1.bf16.msra.mxu1 %v3171_v30  ;;  %2873 = vmatpush3.bf16.msra.mxu0 %v3175_v31  ;;  %v3546_v30 = vpack.c.bf16 %v376_v27, %v376_v27  ;;  %v3231_v31 = vld [vmem:[#allocation4 + $0x240] ss:$12 sps:$4 sm:$0xff]  }
 0x15f   :  { %1894 = vmatprep.subr.bf16.mxu1 %v3178_v32  ;;  %2874 = vmatprep.subr.bf16.mxu0 %v3179_v33  ;;  %v3256_v32 = vld [vmem:[%s3719_s7] sm:$0xff]   ;;  %v3236_v33 = vld [vmem:[#allocation4 + $0x25c] ss:$12 sps:$4 sm:$0xff]  }
 0x162   :  { %1895 = vmatpush1.bf16.msra.mxu1 %v3176_v36  ;;  %2875 = vmatpush3.bf16.msra.mxu0 %v3180_v37  ;;  %v3258_v36 = vld [vmem:[%s3719_s7 + $0x8] sm:$0xff]   ;;  %v3239_v37 = vld [vmem:[#allocation4 + $0x274] ss:$12 sps:$4 sm:$0xff]  }
 0x163   :  { %1896 = vmatprep.subr.bf16.mxu1 %v3183_v38  ;;  %2876 = vmatprep.subr.bf16.mxu0 %v3184_v39  ;;  %v3259_v38 = vld [vmem:[%s3719_s7 + $0x50] sm:$0xff]  }
 0x164   :  { %v3237_v39 = vld [vmem:[#allocation4 + $0x270] ss:$12 sps:$4 sm:$0xff]  }
 0x166   :  { %1897 = vmatpush1.bf16.msra.mxu1 %v3181_v42  ;;  %2877 = vmatpush3.bf16.msra.mxu0 %v3185_v43  ;;  %v3261_v42 = vld [vmem:[%s3719_s7 + $0x58] sm:$0xff]   ;;  %v3240_v43 = vld [vmem:[#allocation4 + $0x288] ss:$12 sps:$4 sm:$0xff]  }
 0x167   :  { %1898 = vmatprep.subr.bf16.mxu1 %v3188_v44  ;;  %2878 = vmatprep.subr.bf16.mxu0 %v3189_v45  ;;  %v3262_v44 = vld [vmem:[%s3719_s7 + $0x18] sm:$0xff]   ;;  %v3245_v45 = vld [vmem:[#allocation4 + $0x2a4] ss:$12 sps:$4 sm:$0xff]  }
 0x16a   :  { %1899 = vmatpush1.bf16.msra.mxu1 %v3186_v48  ;;  %2879 = vmatpush3.bf16.msra.mxu0 %v3190_v49  ;;  %v3264_v48 = vld [vmem:[%s3719_s7 + $0x20] sm:$0xff]   ;;  %v3248_v49 = vld [vmem:[#allocation4 + $0x2bc] ss:$12 sps:$4 sm:$0xff]  }
 0x16b   :  { %1909 = vmatprep.subr.bf16.mxu1 %v3193_v50  ;;  %2886 = vmatprep.subr.bf16.mxu0 %v3194_v51  ;;  %v3265_v50 = vld [vmem:[%s3719_s7 + $0x68] sm:$0xff]   ;;  %v3246_v51 = vld [vmem:[#allocation4 + $0x2b8] ss:$12 sps:$4 sm:$0xff]  }
 0x16d   :  { %1901 = vmatmul.mubr.bf16.vlgmr.msra.gmra.mrb[24].mxu1 %v382_v52  ;;  %1983 = vmatmul.mubr.bf16.vlgmr.msra.gmra.mrb[4].mxu0 %v382_v52  ;;  %v3251_v52 = vld [vmem:[#allocation4 + $0x2d4] ss:$12 sps:$4 sm:$0xff]  }
 0x16e   :  { %1910 = vmatpush1.bf16.msra.mxu1 %v3191_v53  ;;  %2887 = vmatpush3.bf16.msra.mxu0 %v3195_v54  ;;  %v3267_v53 = vld [vmem:[%s3719_s7 + $0x70] sm:$0xff]  }
 0x16f   :  { %1911 = vmatprep.subr.bf16.mxu1 %v3198_v55  ;;  %2888 = vmatprep.subr.bf16.mxu0 %v3199_v56  ;;  %v3249_v54 = vld [vmem:[#allocation4 + $0x2d0] ss:$12 sps:$4 sm:$0xff]   ;;  %v3254_v56 = vld [vmem:[#allocation4 + $0x2ec] ss:$12 sps:$4 sm:$0xff]  }
 0x170   :  { %2022 = vmatprep.mubr.bf16.mxu0 %v385_v11  ;;  %1941 = vmatprep.mubr.bf16.mxu1 %v385_v11  ;;  %v3268_v55 = vld [vmem:[%s3719_s7 + $0x30] sm:$0xff]   ;;  %v3269_v11 = vld [vmem:[%s3719_s7 + $0x78] sm:$0xff]  }
 0x172   :  { %1912 = vmatpush1.bf16.msra.mxu1 %v3196_v57  ;;  %2889 = vmatpush3.bf16.msra.mxu0 %v3200_v58  ;;  %v3252_v57 = vld [vmem:[#allocation4 + $0x2e8] ss:$12 sps:$4 sm:$0xff]   ;;  %v3270_v58 = vld [vmem:[%s3719_s7 + $0x38] sm:$0xff]  }
 0x173   :  { %1913 = vmatprep.subr.bf16.mxu1 %v3203_v60  ;;  %2890 = vmatprep.subr.bf16.mxu0 %v3204_v61  ;;  %v514_v60 = vld [vmem:[%s3716_s4] sm:$0x7] }
 0x176   :  { %1914 = vmatpush1.bf16.msra.mxu1 %v3201_v62  ;;  %2891 = vmatpush3.bf16.msra.mxu0 %v3205_v63  ;;  %v527_v62 = vrot.slane %v514_v60, %v3515_v3 }
 0x177   :  { %1915 = vmatprep.subr.bf16.mxu1 %v3208_v0  ;;  %2892 = vmatprep.subr.bf16.mxu0 %v3209_v1 }
 0x17a   :  { %1916 = vmatpush1.bf16.msra.mxu1 %v3206_v2  ;;  %2893 = vmatpush3.bf16.msra.mxu0 %v3210_v4 }
 0x17b   :  { %1917 = vmatprep.subr.bf16.mxu1 %v3213_v5  ;;  %2894 = vmatprep.subr.bf16.mxu0 %v3214_v6  ;;  %v3271_v5 = vld [vmem:[%s3719_s7 + $0xc0] sm:$0xff]  }
 0x17c   :  { %v3272_v6 = vld [vmem:[%s3719_s7 + $0x140] sm:$0xff]  }
 0x17e   :  { %1918 = vmatpush1.bf16.msra.mxu1 %v3211_v8  ;;  %2895 = vmatpush3.bf16.msra.mxu0 %v3215_v10  ;;  %v3275_v8 = vld [vmem:[%s3719_s7 + $0xc8] sm:$0xff]  }
 0x17f   :  { %1919 = vmatprep.subr.bf16.mxu1 %v3218_v12  ;;  %2896 = vmatprep.subr.bf16.mxu0 %v3219_v13  ;;  %v3277_v10 = vld [vmem:[%s3719_s7 + $0x88] sm:$0xff]   ;;  %v3279_v12 = vld [vmem:[%s3719_s7 + $0xd0] sm:$0xff]  }
 0x180   :  { %v3281_v13 = vld [vmem:[%s3719_s7 + $0x90] sm:$0xff]  }
 0x182   :  { %1920 = vmatpush1.bf16.msra.mxu1 %v3216_v15  ;;  %2897 = vmatpush3.bf16.msra.mxu0 %v3220_v16  ;;  %v3285_v15 = vld [vmem:[%s3719_s7 + $0x98] sm:$0xff]   ;;  %v3287_v16 = vld [vmem:[%s3719_s7 + $0xe0] sm:$0xff]  }
 0x183   :  { %1921 = vmatprep.subr.bf16.mxu1 %v3223_v17  ;;  %2898 = vmatprep.subr.bf16.mxu0 %v3224_v18  ;;  %v3289_v17 = vld [vmem:[%s3719_s7 + $0xa0] sm:$0xff]   ;;  %v3291_v18 = vld [vmem:[%s3719_s7 + $0xe8] sm:$0xff]  }
 0x186   :  { %1922 = vmatpush1.bf16.msra.mxu1 %v3221_v19  ;;  %2899 = vmatpush3.bf16.msra.mxu0 %v3225_v20  ;;  %v3295_v19 = vld [vmem:[%s3719_s7 + $0xf0] sm:$0xff]  }
 0x187   :  { %1923 = vmatprep.subr.bf16.mxu1 %v3228_v21  ;;  %2900 = vmatprep.subr.bf16.mxu0 %v3229_v26  ;;  %v3297_v20 = vld [vmem:[%s3719_s7 + $0xb0] sm:$0xff]  }
 0x18a   :  { %1924 = vmatpush1.bf16.msra.mxu1 %v3226_v24  ;;  %2901 = vmatpush3.bf16.msra.mxu0 %v3230_v28  ;;  %v3299_v28 = vld [vmem:[%s3719_s7 + $0xf8] sm:$0xff]  }
 0x18b   :  { %1925 = vmatprep.subr.bf16.mxu1 %v3233_v29  ;;  %2908 = vmatprep.subr.bf16.mxu0 %v3255_v9  ;;  %v3301_v9 = vld [vmem:[%s3719_s7 + $0xb8] sm:$0xff]  }
 0x18d   :  { %2023 = vmatmul.mubr.bf16.vlgmr.msra.gmra.mrb[8].mxu0 %v3546_v30 }
 0x18e   :  { %1926 = vmatpush1.bf16.msra.mxu1 %v3231_v31  ;;  %2909 = vmatpush3.bf16.msra.mxu0 %v3256_v32  ;;  %v519_v31 = vrot.slane %v514_v60, %v3494_v23  ;;  %v523_v32 = vrot.slane %v514_v60, %v3502_v25  ;;  %v3302_v60 = vld [vmem:[%s3719_s7 + $0x138] sm:$0xff]  }
 0x18f   :  { %1927 = vmatprep.subr.bf16.mxu1 %v3236_v33  ;;  %2910 = vmatprep.subr.bf16.mxu0 %v3257_v34 }
 0x192   :  { %1928 = vmatpush1.bf16.msra.mxu1 %v3234_v35  ;;  %2911 = vmatpush3.bf16.msra.mxu0 %v3258_v36 }
 0x193   :  { %1929 = vmatprep.subr.bf16.mxu1 %v3239_v37  ;;  %2912 = vmatprep.subr.bf16.mxu0 %v3259_v38 }
 0x196   :  { %1930 = vmatpush1.bf16.msra.mxu1 %v3237_v39  ;;  %2913 = vmatpush3.bf16.msra.mxu0 %v3260_v40 }
 0x197   :  { %1931 = vmatprep.subr.bf16.mxu1 %v3242_v41  ;;  %2914 = vmatprep.subr.bf16.mxu0 %v3261_v42  ;;  %v3274_v42 = vld [vmem:[%s3719_s7 + $0x100] sm:$0xff]  }
 0x19a   :  { %1932 = vmatpush1.bf16.msra.mxu1 %v3240_v43  ;;  %2915 = vmatpush3.bf16.msra.mxu0 %v3262_v44  ;;  %v3276_v44 = vld [vmem:[%s3719_s7 + $0x148] sm:$0xff]  }
 0x19b   :  { %1933 = vmatprep.subr.bf16.mxu1 %v3245_v45  ;;  %2916 = vmatprep.subr.bf16.mxu0 %v3263_v46  ;;  %v3278_v45 = vld [vmem:[%s3719_s7 + $0x108] sm:$0xff]   ;;  %v3280_v46 = vld [vmem:[%s3719_s7 + $0x150] sm:$0xff]  }
 0x19e   :  { %1934 = vmatpush1.bf16.msra.mxu1 %v3243_v47  ;;  %2917 = vmatpush3.bf16.msra.mxu0 %v3264_v48  ;;  %v3282_v47 = vld [vmem:[%s3719_s7 + $0x110] sm:$0xff]   ;;  %v3284_v48 = vld [vmem:[%s3719_s7 + $0x158] sm:$0xff]  }
 0x19f   :  { %1935 = vmatprep.subr.bf16.mxu1 %v3248_v49  ;;  %2918 = vmatprep.subr.bf16.mxu0 %v3265_v50  ;;  %v3286_v49 = vld [vmem:[%s3719_s7 + $0x118] sm:$0xff]   ;;  %v3288_v50 = vld [vmem:[%s3719_s7 + $0x160] sm:$0xff]  }
 0x1a2   :  { %1936 = vmatpush1.bf16.msra.mxu1 %v3246_v51  ;;  %2919 = vmatpush3.bf16.msra.mxu0 %v3266_v59  ;;  %v3290_v51 = vld [vmem:[%s3719_s7 + $0x120] sm:$0xff]   ;;  %v3292_v59 = vld [vmem:[%s3719_s7 + $0x168] sm:$0xff]  }
 0x1a3   :  { %1937 = vmatprep.subr.bf16.mxu1 %v3251_v52  ;;  %2920 = vmatprep.subr.bf16.mxu0 %v3267_v53  ;;  %v3294_v52 = vld [vmem:[%s3719_s7 + $0x128] sm:$0xff]   ;;  %v3296_v53 = vld [vmem:[%s3719_s7 + $0x170] sm:$0xff]  }
 0x1a6   :  { %1938 = vmatpush1.bf16.msra.mxu1 %v3249_v54  ;;  %2921 = vmatpush3.bf16.msra.mxu0 %v3268_v55  ;;  %v3298_v54 = vld [vmem:[%s3719_s7 + $0x130] sm:$0xff]   ;;  %v3300_v55 = vld [vmem:[%s3719_s7 + $0x178] sm:$0xff]  }
 0x1a7   :  { %1939 = vmatprep.subr.bf16.mxu1 %v3254_v56  ;;  %2922 = vmatprep.subr.bf16.mxu0 %v3269_v11 }
 0x1aa   :  { %1940 = vmatpush1.bf16.msra.mxu1 %v3252_v57  ;;  %2923 = vmatpush3.bf16.msra.mxu0 %v3270_v58 }
 0x1ab   :  { %2930 = vmatprep.subr.bf16.mxu1 %v3271_v5  ;;  %2952 = vmatprep.subr.bf16.mxu0 %v3272_v6 }
 0x1ad   :  { %1942 = vmatmul.mubr.bf16.vlgmr.msra.gmra.mrb[24].mxu1 %v3546_v30 }
 0x1ae   :  { %2931 = vmatpush3.bf16.msra.mxu1 %v3273_v7 }
 0x1af   :  { %2932 = vmatprep.subr.bf16.mxu1 %v3275_v8 }
 0x1b2   :  { %2933 = vmatpush3.bf16.msra.mxu1 %v3277_v10 }
 0x1b3   :  { %2934 = vmatprep.subr.bf16.mxu1 %v3279_v12 }
 0x1b6   :  { %2935 = vmatpush3.bf16.msra.mxu1 %v3281_v13 }
 0x1b7   :  { %2936 = vmatprep.subr.bf16.mxu1 %v3283_v14 }
 0x1ba   :  { %2937 = vmatpush3.bf16.msra.mxu1 %v3285_v15 }
 0x1bb   :  { %2938 = vmatprep.subr.bf16.mxu1 %v3287_v16 }
 0x1be   :  { %2939 = vmatpush3.bf16.msra.mxu1 %v3289_v17 }
 0x1bf   :  { %2940 = vmatprep.subr.bf16.mxu1 %v3291_v18 }
 0x1c2   :  { %2941 = vmatpush3.bf16.msra.mxu1 %v3293_v22 }
 0x1c3   :  { %2942 = vmatprep.subr.bf16.mxu1 %v3295_v19 }
 0x1c6   :  { %2943 = vmatpush3.bf16.msra.mxu1 %v3297_v20 }
 0x1c7   :  { %2944 = vmatprep.subr.bf16.mxu1 %v3299_v28 }
 0x1ca   :  { %2945 = vmatpush3.bf16.msra.mxu1 %v3301_v9  ;;  %v2771_v9 = vld [vmem:[%s3720_s8] ss:$0 sm:$0xff] }
 0x1e0   :  { %v2836_v61 = vpop.f32.mrb[16].mxu1 }
 0x1e1   :  { %v2837_v63 = vpop.f32.mrb[17].mxu1 }
 0x1e2   :  { %v2838_v0 = vadd.f32 %v2837_v63, %v2836_v61  ;;  %v2839_v1 = vpop.f32.mrb[18].mxu1 }
 0x1e3   :  { %v2840_v2 = vpop.f32.mrb[19].mxu1 }
 0x1e4   :  { %v1160_v4 = vadd.f32 %v2838_v0, %v527_v62  ;;  %v1339_v62 = vld [vmem:[%s3718_s6] sm:$0x7] }
 0x1e5   :  { %v1352_v63 = vrot.slane %v1339_v62, %v3515_v3  ;;  %v1344_v12 = vrot.slane %v1339_v62, %v3494_v23  ;;  %v1348_v13 = vrot.slane %v1339_v62, %v3502_v25 }
 0x200   :  { %v2858_v21 = vpop.f32.mrb[20].mxu1 }
 0x201   :  { %v2859_v26 = vpop.f32.mrb[21].mxu1 }
 0x202   :  { %v2860_v27 = vadd.f32 %v2859_v26, %v2858_v21  ;;  %v2861_v24 = vpop.f32.mrb[22].mxu1 }
 0x203   :  { %v2862_v29 = vpop.f32.mrb[23].mxu1 }
 0x204   :  { %v3650_v30 = vadd.f32 %v2860_v27, %v1160_v4 }
 0x206   :  { %v1207_v17 = vmax.f32 %v3650_v30, 0.0 }
 0x208   :  { %v1210_v26 = vpack.c.bf16 %v1207_v17, %v1207_v17 }
 0x220   :  { %v1118_v33 = vpop.f32.mrb[0].mxu0 }
 0x221   :  { %v2974_v34 = vadd.f32 %v1118_v33, %v519_v31  ;;  %v1120_v35 = vpop.f32.mrb[1].mxu0 }
 0x222   :  { %v2975_v36 = vadd.f32 %v1120_v35, %v523_v32  ;;  %v1122_v37 = vpop.f32.mrb[2].mxu0 }
 0x223   :  { %v1205_v38 = vmax.f32 %v2974_v34, 0.0  ;;  %v1123_v39 = vpop.f32.mrb[3].mxu0 }
 0x224   :  { %v1206_v40 = vmax.f32 %v2975_v36, 0.0 }
 0x225   :  { %v1208_v43 = vpack.c.bf16 %v1205_v38, %v1205_v38 }
 0x226   :  { %v1209_v41 = vpack.c.bf16 %v1206_v40, %v1206_v40 }
 0x228   :  { %2459 = vmatprep.mubr.bf16.mxu0 %v1209_v41 }
 0x229   :  { %2460 = vmatmul.mubr.bf16.vlgmr.msra.gmra.mrb[12].mxu0 %v1208_v43 }
 0x22a   :  { %2953 = vmatpush3.bf16.msra.mxu0 %v3274_v42 }
 0x22b   :  { %2954 = vmatprep.subr.bf16.mxu0 %v3276_v44 }
 0x22e   :  { %2955 = vmatpush3.bf16.msra.mxu0 %v3278_v45 }
 0x22f   :  { %2956 = vmatprep.subr.bf16.mxu0 %v3280_v46 }
 0x232   :  { %2957 = vmatpush3.bf16.msra.mxu0 %v3282_v47 }
 0x233   :  { %2958 = vmatprep.subr.bf16.mxu0 %v3284_v48 }
 0x236   :  { %2959 = vmatpush3.bf16.msra.mxu0 %v3286_v49 }
 0x237   :  { %2960 = vmatprep.subr.bf16.mxu0 %v3288_v50 }
 0x23a   :  { %2961 = vmatpush3.bf16.msra.mxu0 %v3290_v51 }
 0x23b   :  { %2962 = vmatprep.subr.bf16.mxu0 %v3292_v59 }
 0x23e   :  { %2963 = vmatpush3.bf16.msra.mxu0 %v3294_v52 }
 0x23f   :  { %2964 = vmatprep.subr.bf16.mxu0 %v3296_v53 }
 0x240   :  { %v2880_v56 = vpop.f32.mrb[4].mxu0 }
 0x241   :  { %v2881_v11 = vpop.f32.mrb[5].mxu0 }
 0x242   :  { %v2882_v57 = vadd.f32 %v2881_v11, %v2880_v56  ;;  %v2883_v58 = vpop.f32.mrb[6].mxu0  ;;  %2965 = vmatpush3.bf16.msra.mxu0 %v3298_v54 }
 0x243   :  { %v2884_v61 = vpop.f32.mrb[7].mxu0  ;;  %2966 = vmatprep.subr.bf16.mxu0 %v3300_v55 }
 0x244   :  { %v1985_v2 = vadd.f32 %v2882_v57, %v1352_v63 }
 0x246   :  { %2967 = vmatpush3.bf16.msra.mxu0 %v3302_v60 }
 0x260   :  { %v2902_v0 = vpop.f32.mrb[8].mxu0 }
 0x261   :  { %v2903_v1 = vpop.f32.mrb[9].mxu0 }
 0x262   :  { %v2904_v4 = vadd.f32 %v2903_v1, %v2902_v0  ;;  %v2905_v5 = vpop.f32.mrb[10].mxu0 }
 0x263   :  { %v2906_v6 = vpop.f32.mrb[11].mxu0 }
 0x264   :  { %v2025_v7 = vadd.f32 %v2904_v4, %v1985_v2 }
 0x266   :  { %v2032_v8 = vmax.f32 %v2025_v7, 0.0 }
 0x268   :  { %v2035_v10 = vpack.c.bf16 %v2032_v8, %v2032_v8 }
 0x26a   :  { %2539 = vmatprep.mubr.bf16.mxu0 %v2035_v10 }
 0x280   :  { %v1943_v14 = vpop.f32.mrb[24].mxu1 }
 0x281   :  { %v2976_v15 = vadd.f32 %v1943_v14, %v1344_v12  ;;  %v1945_v16 = vpop.f32.mrb[25].mxu1 }
 0x282   :  { %v2977_v3 = vadd.f32 %v1945_v16, %v1348_v13  ;;  %v1947_v18 = vpop.f32.mrb[26].mxu1 }
 0x283   :  { %v2030_v22 = vmax.f32 %v2976_v15, 0.0  ;;  %v1948_v19 = vpop.f32.mrb[27].mxu1 }
 0x284   :  { %v2031_v20 = vmax.f32 %v2977_v3, 0.0 }
 0x285   :  { %v2033_v21 = vpack.c.bf16 %v2030_v22, %v2030_v22 }
 0x286   :  { %v2034_v27 = vpack.c.bf16 %v2031_v20, %v2031_v20 }
 0x287   :  { %2499 = vmatprep.mubr.bf16.mxu1 %v2033_v21 }
 0x288   :  { %2500 = vmatmul.mubr.bf16.vlgmr.msra.gmra.mrb[28].mxu1 %v1210_v26  ;;  %2540 = vmatmul.mubr.bf16.vlgmr.msra.gmra.mrb[16].mxu0 %v2034_v27 }
 0x2fc   :  { %v2924_v24 = vpop.f32.mrb[12].mxu0 }
 0x2fd   :  { %v2925_v23 = vpop.f32.mrb[13].mxu0 }
 0x2fe   :  { %v2926_v28 = vadd.f32 %v2925_v23, %v2924_v24  ;;  %v2927_v25 = vpop.f32.mrb[14].mxu0 }
 0x2ff   :  { %v2928_v29 = vpop.f32.mrb[15].mxu0 }
 0x300   :  { %v2462_v34 = vadd.f32 %v2926_v28, %v2771_v9 }
 0x35b   :  { %v2946_v30 = vpop.f32.mrb[28].mxu1  ;;  %v2968_v31 = vpop.f32.mrb[16].mxu0 }
 0x35c   :  { %v2947_v32 = vpop.f32.mrb[29].mxu1  ;;  %v2969_v33 = vpop.f32.mrb[17].mxu0 }
 0x35d   :  { %v2948_v35 = vadd.f32 %v2947_v32, %v2946_v30  ;;  %v2970_v36 = vadd.f32 %v2969_v33, %v2968_v31  ;;  %v2949_v37 = vpop.f32.mrb[30].mxu1  ;;  %v2971_v38 = vpop.f32.mrb[18].mxu0 }
 0x35e   :  { %v2950_v39 = vpop.f32.mrb[31].mxu1  ;;  %v2972_v40 = vpop.f32.mrb[19].mxu0 }
 0x35f   :  { %v2502_v41 = vadd.f32 %v2948_v35, %v2462_v34 }
 0x361   :  { %v2542_v42 = vadd.f32 %v2970_v36, %v2502_v41 }
 0x363   :  { %2548 = vst.msk [vmem:[%s3721_s9] sm:$0xff] %vm2547_vm2, %v2542_v42 }
 0x364   :  { %2553 = vsyncpa [#allocation3], 1 }
 0x365   :  { %2554 = vsyncpa [#allocation5], 1 }

</bundles_post_ra>
